<compile_context>
chip_gen: v5e
topology: v5e:2x2
jax: 0.10.0
libtpu: 0.0.40
codegen_flags: <defaults>
</compile_context>

<pallas_src>
import functools

import jax
import jax.numpy as jnp
import numpy as np
from jax.experimental import pallas as pl
from jax.experimental.pallas import tpu as pltpu


def _rup(x, m):
    return ((x + m - 1) // m) * m


# "NT" contraction (contract the minor dim of both operands), i.e. W @ x^T.
_NT_DIMS = (((1,), (1,)), ((), ()))


# --------------------------------------------------------------------------- #
# Kernel: batch sits on the 128-lane axis for every intermediate and store.
# --------------------------------------------------------------------------- #
def qmixer_kernel(x_ref, wbig_ref, w23_ref, consts_ref, out_ref,
                  *, n_agents, H, E):
    f32 = jnp.float32
    hi = jax.lax.Precision.HIGHEST
    nH = n_agents * H
    nE = n_agents * E
    R1 = nH + nE + 3 * E                      # rows of the fused layer-1 weight

    # ---- packed constants (biases + V-head weight), 8-row aligned segments
    consts = consts_ref[...]                  # (C, 1) f32
    o_b2 = _rup(R1, 8)
    o_b3 = o_b2 + _rup(nH, 8)
    o_wv = o_b3 + _rup(n_agents, 8)
    o_bv = o_wv + _rup(E, 8)
    b_big = consts[:R1, :]
    b2 = consts[o_b2:o_b2 + nH, :]
    b3 = consts[o_b3:o_b3 + n_agents, :]
    wv2c = consts[o_wv:o_wv + E, :]           # V second-layer weight as a column
    bv2 = consts[o_bv:o_bv + 1, :]

    # ---- fused layer 1 + hyper-nets: one bf16 MXU push, feature-major result
    x = x_ref[...]                            # (block_b, F_pad) bf16, batch-major
    big = jax.lax.dot_general(
        wbig_ref[...], x, _NT_DIMS,           # (R1, F_pad) @ (block_b, F_pad)^T
        preferred_element_type=f32) + b_big   # (R1, block_b)

    h = jnp.maximum(big[:nH, :], 0.0)         # agent hidden-1       (nH, bb)
    hyp = big[nH:, :]                         # hyper-net outputs    (nE+3E, bb)

    # ---- agent MLP layers 2 & 3 (block-diagonal, f32, full precision)
    w2 = w23_ref[:nH, :]
    w3 = w23_ref[nH:nH + n_agents, :]
    h2 = jnp.maximum(
        jnp.dot(w2, h, preferred_element_type=f32, precision=hi) + b2, 0.0)
    aqT = jnp.dot(w3, h2, preferred_element_type=f32, precision=hi) + b3   # (n, bb)

    # ---- mixing network
    w1T = hyp[:nE, :]                         # (n*E, bb)
    b1T = hyp[nE:nE + E, :]                   # (E, bb)
    wfT = hyp[nE + E:nE + 2 * E, :]           # (E, bb)
    vhT = jnp.maximum(hyp[nE + 2 * E:nE + 3 * E, :], 0.0)   # V hidden (E, bb)

    # hidden = ELU(sum_i q_i * w1_i + b1): per-agent sublane broadcast,
    # no expansion matmul and no (n*E, bb) materialized intermediates.
    hidden_pre = b1T
    for i in range(n_agents):                 # static unroll
        hidden_pre = hidden_pre + w1T[i * E:(i + 1) * E, :] * aqT[i:i + 1, :]
    hidden = jnp.where(hidden_pre > 0, hidden_pre,
                       jnp.exp(jnp.minimum(hidden_pre, 0.0)) - 1.0)   # ELU, safe

    # q_tot = <hidden, w_final> + V(s0); the V head is folded into a second
    # cross-sublane reduction instead of an M=1 MXU push.
    qtotT = (jnp.sum(hidden * wfT, axis=0, keepdims=True)
             + jnp.sum(vhT * wv2c, axis=0, keepdims=True)
             + bv2)                           # (1, bb)

    # merged lane-dense output: row 0 = q_tot, rows 1..n = agent_qs
    out_ref[0:1, :] = qtotT
    out_ref[1:1 + n_agents, :] = aqT


# --------------------------------------------------------------------------- #
# Parameters (PyTorch nn.Linear layout) and fusion into kernel operands
# --------------------------------------------------------------------------- #
def make_params(key, S, A, n_agents, E):
    def linear(k, fan_in, fan_out):
        kw, kb = jax.random.split(k)
        bound = 1.0 / np.sqrt(fan_in)
        W = jax.random.uniform(kw, (fan_out, fan_in), jnp.float32, -bound, bound)
        b = jax.random.uniform(kb, (fan_out,), jnp.float32, -bound, bound)
        return W, b

    keys = jax.random.split(key, 3 * n_agents + 5)
    W1, b1, W2, b2, W3, b3 = [], [], [], [], [], []
    for i in range(n_agents):
        W, b = linear(keys[3 * i + 0], S + A, 32); W1.append(W); b1.append(b)
        W, b = linear(keys[3 * i + 1], 32, 32);    W2.append(W); b2.append(b)
        W, b = linear(keys[3 * i + 2], 32, 1);     W3.append(W); b3.append(b)
    Wh1, bh1 = linear(keys[3 * n_agents + 0], S, E * n_agents)
    Wb1, bb1 = linear(keys[3 * n_agents + 1], S, E)
    Whf, bhf = linear(keys[3 * n_agents + 2], S, E)
    Wv1, bv1 = linear(keys[3 * n_agents + 3], S, E)
    Wv2, bv2 = linear(keys[3 * n_agents + 4], E, 1)
    return dict(
        W1=jnp.stack(W1), b1=jnp.stack(b1),
        W2=jnp.stack(W2), b2=jnp.stack(b2),
        W3=jnp.stack(W3), b3=jnp.stack(b3),
        Wh1=Wh1, bh1=bh1, Wb1=Wb1, bb1=bb1, Whf=Whf, bhf=bhf,
        Wv1=Wv1, bv1=bv1, Wv2=Wv2, bv2=bv2)


def fuse_params(p, n_agents, S, E):
    """Pack raw weights into the 3 arrays the kernel consumes:
       wbig  (bf16): fused [block-diag agent layer-1 | hyper_w_1 | hyper_b_1 |
                     hyper_w_final | V layer-1], columns padded to 128 lanes
       w23   (f32) : block-diag agent layer-2 stacked over layer-3 rows
       consts(f32) : all biases + V layer-2 weight, packed column (8-row segments)
    """
    P = {k: np.asarray(v, np.float32) for k, v in p.items()}
    H = P["W2"].shape[1]
    A = P["W1"].shape[2] - S
    nH, nE = n_agents * H, n_agents * E
    F = n_agents * (S + A)
    F_pad = _rup(F, 128)                      # lane-aligned NT contraction dim
    R1 = nH + nE + 3 * E

    wbig = np.zeros((R1, F_pad), np.float32)
    for i in range(n_agents):
        wbig[i * H:(i + 1) * H, i * S:(i + 1) * S] = P["W1"][i][:, :S]
        wbig[i * H:(i + 1) * H,
             n_agents * S + i * A: n_agents * S + (i + 1) * A] = P["W1"][i][:, S:]
    wbig[nH:nH + nE, :S] = P["Wh1"]
    wbig[nH + nE:nH + nE + E, :S] = P["Wb1"]
    wbig[nH + nE + E:nH + nE + 2 * E, :S] = P["Whf"]
    wbig[nH + nE + 2 * E:nH + nE + 3 * E, :S] = P["Wv1"]

    w23 = np.zeros((_rup(nH + n_agents, 8), nH), np.float32)
    for i in range(n_agents):
        w23[i * H:(i + 1) * H, i * H:(i + 1) * H] = P["W2"][i]
        w23[nH + i, i * H:(i + 1) * H] = P["W3"][i][0]

    b_big = np.concatenate([P["b1"].reshape(-1), P["bh1"], P["bb1"],
                            P["bhf"], P["bv1"]]).reshape(-1, 1)

    def pad8(a):
        r = (-a.shape[0]) % 8
        return np.pad(a, ((0, r), (0, 0))) if r else a

    consts = np.concatenate([
        pad8(b_big),
        pad8(P["b2"].reshape(-1, 1)),
        pad8(P["b3"].reshape(-1, 1)),
        pad8(P["Wv2"].reshape(-1, 1)),
        pad8(P["bv2"].reshape(-1, 1))], axis=0)

    return dict(wbig=jnp.asarray(wbig, jnp.bfloat16),
                w23=jnp.asarray(w23, jnp.float32),
                consts=jnp.asarray(consts, jnp.float32),
                dims=dict(H=H, E=E, A=A, S=S, F=F, F_pad=F_pad))


# --------------------------------------------------------------------------- #
# Wrapper
# --------------------------------------------------------------------------- #
def _pick_block_b(bs, block_b=None):
    bs128 = _rup(bs, 128)
    if block_b is None:
        block_b = min(1024, bs128)
        # Give the single "parallel" grid axis >= 2 steps whenever the batch
        # allows it, so v7x can shard the loop across its two TensorCores
        # (costs only ~0.35us extra step overhead on v5e/v6e).
        if bs128 // block_b < 2 and bs128 >= 256:
            block_b = _rup(bs128 // 2, 128)
    return _rup(block_b, 128)


def qmixer_forward(states, actions, fused, block_b=None):
    bs, n_agents, S = states.shape
    A = actions.shape[2]
    wbig, w23, consts = fused["wbig"], fused["w23"], fused["consts"]
    dims = fused["dims"]
    H, E, F, F_pad = dims["H"], dims["E"], dims["F"], dims["F_pad"]
    assert dims["S"] == S and dims["A"] == A

    block_b = _pick_block_b(bs, block_b)
    bs_pad = _rup(bs, block_b)
    grid = (bs_pad // block_b,)

    # Batch-major bf16 input [states | actions]; no host-side transpose.
    x = jnp.concatenate([states.reshape(bs, n_agents * S),
                         actions.reshape(bs, n_agents * A)],
                        axis=-1).astype(jnp.bfloat16)
    x = jnp.pad(x, ((0, bs_pad - bs), (0, F_pad - F)))

    kernel = functools.partial(qmixer_kernel, n_agents=n_agents, H=H, E=E)

    in_specs = [
        pl.BlockSpec((block_b, F_pad), lambda b: (b, 0)),       # activations
        pl.BlockSpec(wbig.shape, lambda b: (0, 0)),             # resident weights
        pl.BlockSpec(w23.shape, lambda b: (0, 0)),
        pl.BlockSpec(consts.shape, lambda b: (0, 0)),
    ]
    out_specs = pl.BlockSpec((n_agents + 1, block_b), lambda b: (0, b))
    out_shape = jax.ShapeDtypeStruct((n_agents + 1, bs_pad), jnp.float32)

    nH = n_agents * H
    mac = int(wbig.shape[0]) * int(wbig.shape[1]) + (nH + n_agents) * nH \
        + (n_agents + 2) * E
    cost = pl.CostEstimate(
        flops=2 * bs_pad * mac,
        transcendentals=bs_pad * E,
        bytes_accessed=int(x.size) * 2 + int(wbig.size) * 2
        + int(w23.size) * 4 + int(consts.size) * 4
        + (n_agents + 1) * bs_pad * 4)

    outT = pl.pallas_call(
        kernel,
        grid=grid,
        in_specs=in_specs,
        out_specs=out_specs,
        out_shape=out_shape,
        compiler_params=pltpu.CompilerParams(dimension_semantics=("parallel",)),
        cost_estimate=cost,
    )(x, wbig, w23, consts)

    out = outT[:, :bs].T                      # (bs, n_agents + 1), tiny transpose
    q_tot = out[:, 0:1]
    agent_qs = out[:, 1:]
    return q_tot, agent_qs


# --------------------------------------------------------------------------- #
# Pure numpy float64 reference (mirrors the PyTorch forward exactly)
# --------------------------------------------------------------------------- #
def qmixer_ref_np(states, actions, p):
    s = np.asarray(states, np.float64)
    a = np.asarray(actions, np.float64)
    P = {k: np.asarray(v, np.float64) for k, v in p.items()}
    bs, n, _ = s.shape
    E = P["Wv2"].shape[1]
    qs = []
    for i in range(n):
        x = np.concatenate([s[:, i], a[:, i]], axis=-1)
        h = np.maximum(x @ P["W1"][i].T + P["b1"][i], 0.0)
        h = np.maximum(h @ P["W2"][i].T + P["b2"][i], 0.0)
        qs.append(h @ P["W3"][i].T + P["b3"][i])
    agent_qs = np.concatenate(qs, axis=-1)
    s0 = s[:, 0]
    w1 = (s0 @ P["Wh1"].T + P["bh1"]).reshape(bs, n, E)
    b1 = s0 @ P["Wb1"].T + P["bb1"]
    wf = s0 @ P["Whf"].T + P["bhf"]
    v = np.maximum(s0 @ P["Wv1"].T + P["bv1"], 0.0) @ P["Wv2"].T + P["bv2"]
    pre = np.einsum("bn,bne->be", agent_qs, w1) + b1
    hidden = np.where(pre > 0, pre, np.exp(np.minimum(pre, 0.0)) - 1.0)
    q_tot = np.sum(hidden * wf, axis=-1, keepdims=True) + v
    return q_tot, agent_qs


def _bf16_round(x):
    return np.asarray(jnp.asarray(x).astype(jnp.bfloat16).astype(jnp.float32))


# --------------------------------------------------------------------------- #
if __name__ == "__main__":
    bs, n_agents, state_dim, action_dim, embed_dim = 16, 3, 16, 5, 32

    key = jax.random.PRNGKey(0)
    kp, ks, ka = jax.random.split(key, 3)
    raw = make_params(kp, state_dim, action_dim, n_agents, embed_dim)
    fused = fuse_params(raw, n_agents, state_dim, embed_dim)
    states = jax.random.normal(ks, (bs, n_agents, state_dim), jnp.float32)
    actions = jax.random.normal(ka, (bs, n_agents, action_dim), jnp.float32)

    q_tot, agent_qs = qmixer_forward(states, actions, fused)
    jax.block_until_ready((q_tot, agent_qs))
    assert q_tot.shape == (bs, 1) and agent_qs.shape == (bs, n_agents)

    # Tight check: reference with the same bf16 rounding the kernel applies to the
    # activations and the fused layer-1 / hyper-net weights.
    raw_q = dict(raw)
    for k in ("W1", "Wh1", "Wb1", "Whf", "Wv1"):
        raw_q[k] = _bf16_round(raw[k])
    q_ref, aq_ref = qmixer_ref_np(_bf16_round(states), _bf16_round(actions), raw_q)
    assert np.allclose(np.asarray(q_tot), q_ref, rtol=2e-3, atol=2e-3)
    assert np.allclose(np.asarray(agent_qs), aq_ref, rtol=2e-3, atol=2e-3)

    # Loose sanity check against the exact f32 module semantics.
    q_ref32, aq_ref32 = qmixer_ref_np(states, actions, raw)
    assert np.allclose(np.asarray(q_tot), q_ref32, rtol=1e-1, atol=1e-1)
    assert np.allclose(np.asarray(agent_qs), aq_ref32, rtol=1e-1, atol=1e-1)

    print("KERNEL_OK")
</pallas_src>

<mosaic_0001>
module attributes {stable_mosaic.version = 11 : i64} {
  func.func @qmixer_kernel(%arg0: i32, %arg1: memref<128x128xbf16, #tpu.memory_space<vmem>>, %arg2: memref<288x128xbf16, #tpu.memory_space<vmem>>, %arg3: memref<104x96xf32, #tpu.memory_space<vmem>>, %arg4: memref<432x1xf32, #tpu.memory_space<vmem>>, %arg5: memref<4x128xf32, #tpu.memory_space<vmem>>) attributes {dimension_semantics = [#tpu.dimension_semantics<parallel>], iteration_bounds = array<i64: 1>, scalar_prefetch = 0 : i64, scratch_operands = 0 : i64, tpu.core_type = #tpu.core_type<tc>, window_params = [{transform_indices = @transform_0, window_bounds = array<i64: 128, 128>}, {pipeline_mode = #tpu.pipeline_mode<synchronous>, transform_indices = @transform_1, window_bounds = array<i64: 288, 128>}, {pipeline_mode = #tpu.pipeline_mode<synchronous>, transform_indices = @transform_2, window_bounds = array<i64: 104, 96>}, {pipeline_mode = #tpu.pipeline_mode<synchronous>, transform_indices = @transform_3, window_bounds = array<i64: 432, 1>}, {transform_indices = @transform_4, window_bounds = array<i64: 4, 128>}]} {
    %c0 = arith.constant 0 : index
    %c0_0 = arith.constant 0 : index
    %0 = vector.load %arg4[%c0, %c0_0] : memref<432x1xf32, #tpu.memory_space<vmem>>, vector<432x1xf32>
    %1 = vector.extract_strided_slice %0 {offsets = [0, 0], sizes = [288, 1], strides = [1, 1]} : vector<432x1xf32> to vector<288x1xf32>
    %2 = vector.extract_strided_slice %0 {offsets = [288, 0], sizes = [96, 1], strides = [1, 1]} : vector<432x1xf32> to vector<96x1xf32>
    %3 = vector.extract_strided_slice %0 {offsets = [384, 0], sizes = [3, 1], strides = [1, 1]} : vector<432x1xf32> to vector<3x1xf32>
    %4 = vector.extract_strided_slice %0 {offsets = [392, 0], sizes = [32, 1], strides = [1, 1]} : vector<432x1xf32> to vector<32x1xf32>
    %5 = vector.extract_strided_slice %0 {offsets = [424, 0], sizes = [1, 1], strides = [1, 1]} : vector<432x1xf32> to vector<1x1xf32>
    %c0_1 = arith.constant 0 : index
    %c0_2 = arith.constant 0 : index
    %6 = vector.load %arg1[%c0_1, %c0_2] : memref<128x128xbf16, #tpu.memory_space<vmem>>, vector<128x128xbf16>
    %c0_3 = arith.constant 0 : index
    %c0_4 = arith.constant 0 : index
    %7 = vector.load %arg2[%c0_3, %c0_4] : memref<288x128xbf16, #tpu.memory_space<vmem>>, vector<288x128xbf16>
    %cst = arith.constant dense<0.000000e+00> : vector<288x128xf32>
    %8 = tpu.matmul %7, %6, %cst {dimension_numbers = #tpu.dot_dimension_numbers<[1], [1], [0], [0], [0, 0, 1, 0], [], []>} : vector<288x128xbf16>, vector<128x128xbf16>, vector<288x128xf32> -> vector<288x128xf32>
    %9 = vector.broadcast %1 : vector<288x1xf32> to vector<288x128xf32>
    %10 = arith.addf %8, %9 : vector<288x128xf32>
    %11 = vector.extract_strided_slice %10 {offsets = [0, 0], sizes = [96, 128], strides = [1, 1]} : vector<288x128xf32> to vector<96x128xf32>
    %cst_5 = arith.constant 0.000000e+00 : f32
    %12 = vector.broadcast %cst_5 : f32 to vector<96x128xf32>
    %13 = arith.maximumf %11, %12 : vector<96x128xf32>
    %14 = vector.extract_strided_slice %10 {offsets = [96, 0], sizes = [192, 128], strides = [1, 1]} : vector<288x128xf32> to vector<192x128xf32>
    %c0_6 = arith.constant 0 : index
    %c0_7 = arith.constant 0 : index
    %15 = vector.load %arg3[%c0_6, %c0_7] : memref<104x96xf32, #tpu.memory_space<vmem>>, vector<96x96xf32>
    %c96 = arith.constant 96 : index
    %c0_8 = arith.constant 0 : index
    %16 = vector.load %arg3[%c96, %c0_8] : memref<104x96xf32, #tpu.memory_space<vmem>>, vector<3x96xf32>
    %cst_9 = arith.constant dense<0.000000e+00> : vector<96x128xf32>
    %17 = tpu.matmul %15, %13, %cst_9 {dimension_numbers = #tpu.dot_dimension_numbers<[1], [0], [0], [1], [0, 0, 1, 1], [], []>, precision = #tpu.contract_precision<fp32>} : vector<96x96xf32>, vector<96x128xf32>, vector<96x128xf32> -> vector<96x128xf32>
    %18 = vector.broadcast %2 : vector<96x1xf32> to vector<96x128xf32>
    %19 = arith.addf %17, %18 : vector<96x128xf32>
    %cst_10 = arith.constant 0.000000e+00 : f32
    %20 = vector.broadcast %cst_10 : f32 to vector<96x128xf32>
    %21 = arith.maximumf %19, %20 : vector<96x128xf32>
    %cst_11 = arith.constant dense<0.000000e+00> : vector<3x128xf32>
    %22 = tpu.matmul %16, %21, %cst_11 {dimension_numbers = #tpu.dot_dimension_numbers<[1], [0], [0], [1], [0, 0, 1, 1], [], []>, precision = #tpu.contract_precision<fp32>} : vector<3x96xf32>, vector<96x128xf32>, vector<3x128xf32> -> vector<3x128xf32>
    %23 = vector.broadcast %3 : vector<3x1xf32> to vector<3x128xf32>
    %24 = arith.addf %22, %23 : vector<3x128xf32>
    %25 = vector.extract_strided_slice %14 {offsets = [0, 0], sizes = [96, 128], strides = [1, 1]} : vector<192x128xf32> to vector<96x128xf32>
    %26 = vector.extract_strided_slice %14 {offsets = [96, 0], sizes = [32, 128], strides = [1, 1]} : vector<192x128xf32> to vector<32x128xf32>
    %27 = vector.extract_strided_slice %14 {offsets = [128, 0], sizes = [32, 128], strides = [1, 1]} : vector<192x128xf32> to vector<32x128xf32>
    %28 = vector.extract_strided_slice %14 {offsets = [160, 0], sizes = [32, 128], strides = [1, 1]} : vector<192x128xf32> to vector<32x128xf32>
    %cst_12 = arith.constant 0.000000e+00 : f32
    %29 = vector.broadcast %cst_12 : f32 to vector<32x128xf32>
    %30 = arith.maximumf %28, %29 : vector<32x128xf32>
    %31 = vector.extract_strided_slice %25 {offsets = [0, 0], sizes = [32, 128], strides = [1, 1]} : vector<96x128xf32> to vector<32x128xf32>
    %32 = vector.extract_strided_slice %24 {offsets = [0, 0], sizes = [1, 128], strides = [1, 1]} : vector<3x128xf32> to vector<1x128xf32>
    %33 = vector.broadcast %32 : vector<1x128xf32> to vector<32x128xf32>
    %34 = arith.mulf %31, %33 : vector<32x128xf32>
    %35 = arith.addf %26, %34 : vector<32x128xf32>
    %36 = vector.extract_strided_slice %25 {offsets = [32, 0], sizes = [32, 128], strides = [1, 1]} : vector<96x128xf32> to vector<32x128xf32>
    %37 = vector.extract_strided_slice %24 {offsets = [1, 0], sizes = [1, 128], strides = [1, 1]} : vector<3x128xf32> to vector<1x128xf32>
    %38 = vector.broadcast %37 : vector<1x128xf32> to vector<32x128xf32>
    %39 = arith.mulf %36, %38 : vector<32x128xf32>
    %40 = arith.addf %35, %39 : vector<32x128xf32>
    %41 = vector.extract_strided_slice %25 {offsets = [64, 0], sizes = [32, 128], strides = [1, 1]} : vector<96x128xf32> to vector<32x128xf32>
    %42 = vector.extract_strided_slice %24 {offsets = [2, 0], sizes = [1, 128], strides = [1, 1]} : vector<3x128xf32> to vector<1x128xf32>
    %43 = vector.broadcast %42 : vector<1x128xf32> to vector<32x128xf32>
    %44 = arith.mulf %41, %43 : vector<32x128xf32>
    %45 = arith.addf %40, %44 : vector<32x128xf32>
    %cst_13 = arith.constant 0.000000e+00 : f32
    %46 = vector.broadcast %cst_13 : f32 to vector<32x128xf32>
    %47 = arith.cmpf ogt, %45, %46 : vector<32x128xf32>
    %cst_14 = arith.constant 0.000000e+00 : f32
    %48 = vector.broadcast %cst_14 : f32 to vector<32x128xf32>
    %49 = arith.minimumf %45, %48 : vector<32x128xf32>
    %50 = math.exp %49 : vector<32x128xf32>
    %cst_15 = arith.constant 1.000000e+00 : f32
    %51 = vector.broadcast %cst_15 : f32 to vector<32x128xf32>
    %52 = arith.subf %50, %51 : vector<32x128xf32>
    %53 = arith.select %47, %45, %52 : vector<32x128xi1>, vector<32x128xf32>
    %54 = arith.mulf %53, %27 : vector<32x128xf32>
    %cst_16 = arith.constant dense<0.000000e+00> : vector<128xf32>
    %55 = vector.multi_reduction <add>, %54, %cst_16 [0] : vector<32x128xf32> to vector<128xf32>
    %56 = vector.shape_cast %55 : vector<128xf32> to vector<1x128xf32>
    %57 = vector.broadcast %4 : vector<32x1xf32> to vector<32x128xf32>
    %58 = arith.mulf %30, %57 : vector<32x128xf32>
    %cst_17 = arith.constant dense<0.000000e+00> : vector<128xf32>
    %59 = vector.multi_reduction <add>, %58, %cst_17 [0] : vector<32x128xf32> to vector<128xf32>
    %60 = vector.shape_cast %59 : vector<128xf32> to vector<1x128xf32>
    %61 = arith.addf %56, %60 : vector<1x128xf32>
    %62 = vector.broadcast %5 : vector<1x1xf32> to vector<1x128xf32>
    %63 = arith.addf %61, %62 : vector<1x128xf32>
    %c0_18 = arith.constant 0 : index
    %c0_19 = arith.constant 0 : index
    %64 = vector.load %arg5[%c0_18, %c0_19] : memref<4x128xf32, #tpu.memory_space<vmem>>, vector<1x128xf32>
    tpu.vector_store %arg5[%c0_18, %c0_19], %63 {strides = array<i32>} : memref<4x128xf32, #tpu.memory_space<vmem>>, vector<1x128xf32>,
    %c1 = arith.constant 1 : index
    %c0_20 = arith.constant 0 : index
    %65 = vector.load %arg5[%c1, %c0_20] : memref<4x128xf32, #tpu.memory_space<vmem>>, vector<3x128xf32>
    tpu.vector_store %arg5[%c1, %c0_20], %24 {strides = array<i32>} : memref<4x128xf32, #tpu.memory_space<vmem>>, vector<3x128xf32>,
    return
  }
  func.func @transform_0(%arg0: i32) -> (i32, i32) {
    %c0_i32 = arith.constant 0 : i32
    %c0_i32_0 = arith.constant 0 : i32
    return %arg0, %c0_i32 : i32, i32
  }
  func.func @transform_1(%arg0: i32) -> (i32, i32) {
    %c0_i32 = arith.constant 0 : i32
    %c0_i32_0 = arith.constant 0 : i32
    %c0_i32_1 = arith.constant 0 : i32
    return %c0_i32, %c0_i32_0 : i32, i32
  }
  func.func @transform_2(%arg0: i32) -> (i32, i32) {
    %c0_i32 = arith.constant 0 : i32
    %c0_i32_0 = arith.constant 0 : i32
    %c0_i32_1 = arith.constant 0 : i32
    return %c0_i32, %c0_i32_0 : i32, i32
  }
  func.func @transform_3(%arg0: i32) -> (i32, i32) {
    %c0_i32 = arith.constant 0 : i32
    %c0_i32_0 = arith.constant 0 : i32
    %c0_i32_1 = arith.constant 0 : i32
    return %c0_i32, %c0_i32_0 : i32, i32
  }
  func.func @transform_4(%arg0: i32) -> (i32, i32) {
    %c0_i32 = arith.constant 0 : i32
    %c0_i32_0 = arith.constant 0 : i32
    return %c0_i32, %arg0 : i32, i32
  }
}

</mosaic_0001>

<bundles_post_ra>
// kernel: tpu_custom_call.1
= control target key start
LH: loop header
LB: loop body
LE: loop exit
PB: predicated region body
PF: predicated region fallthrough
CT: control target
= control target key end

     0   :  { %v1919_v1 = vmov 0   ;;  %s2923_s0 = inlined_call_operand.vmem [shape: bf16[128,128], index: 0, kind: input, shape index: {}]   ;;  %s2924_s1 = inlined_call_operand.vmem [shape: bf16[288,128], index: 1, kind: input, shape index: {}]   ;;  %s2925_s2 = inlined_call_operand.vmem [shape: f32[104,96], index: 2, kind: input, shape index: {}]   ;;  %s2926_s3 = inlined_call_operand.vmem [shape: f32[432,1], index: 3, kind: input, shape index: {}]   ;;  %s2927_s4 = inlined_call_operand.hbm [shape: f32[4,128], index: 4, kind: output, shape index: {}]  }
   0x1   :  { %v1861_v0 = vld [vmem:[%s2923_s0 + $0x38] sm:$0xff]  ;;  %1882 = vset.pattern.permute.xlu0 %v1919_v1  ;;  %1883 = vset.pattern.permute.xlu1 %v1919_v1  ;;  %v27_v3 = vld [vmem:[%s2926_s3 + $0x48] sm:$0xff] }
   0x2   :  { %v29_v2 = vld [vmem:[%s2926_s3 + $0x58] sm:$0xff]  ;;  %460 = vmatpush.bf16.xpose.msra.mxu0 %v1861_v0  ;;  %171 = vperm.xlu1 %1883, %v27_v3  }
   0x3   :  { %181 = vperm.xlu0 %1882, %v29_v2   ;;  %1884 = vset.pattern.permute.xlu2 %v1919_v1 }
   0x4   :  { %9 = vsyncpa [#allocation3], 0  ;;  %v1860_v4 = vld [vmem:[%s2923_s0 + $0x30] sm:$0xff]  ;;  %v26_v6 = vld [vmem:[%s2926_s3 + $0x40] sm:$0xff]  ;;  %vm644_vm0 = vcmask 785408   ;;  %s1737_s14 = sshll.u32 %s2927_s4, 4  ;;  %s1738_s14 = int_to_ptr.hbm [resolvable:$true] %s1737_s14 }
   0x5   :  { %v28_v5 = vld [vmem:[%s2926_s3 + $0x50] sm:$0xff]  ;;  %v1859_v7 = vld [vmem:[%s2923_s0 + $0x28] sm:$0xff]  ;;  %v22_v9 = vld [vmem:[%s2926_s3 + $0x20] sm:$0xff] }
   0x6   :  { %v23_v8 = vld [vmem:[%s2926_s3 + $0x28] sm:$0xff]  ;;  %v25_v10 = vld [vmem:[%s2926_s3 + $0x38] sm:$0xff]  ;;  %v1858_v11 = vld [vmem:[%s2923_s0 + $0x20] sm:$0xff] }
   0x7   :  { %161 = vperm.xlu2 %1884, %v25_v10   ;;  %v20_v12 = vld [vmem:[%s2926_s3 + $0x10] sm:$0xff]  ;;  %v19_v13 = vld [vmem:[%s2926_s3 + $0x8] sm:$0xff]  ;;  %v1857_v15 = vld [vmem:[%s2923_s0 + $0x18] sm:$0xff] }
   0x8   :  { %v24_v14 = vld [vmem:[%s2926_s3 + $0x30] sm:$0xff]  ;;  %v65_v16 = vld [vmem:[%s2926_s3 + $0x178] sm:$0xff]  ;;  %v62_v20 = vld [vmem:[%s2926_s3 + $0x160] sm:$0xff] }
   0x9   :  { %v64_v17 = vld [vmem:[%s2926_s3 + $0x170] sm:$0xff]  ;;  %v21_v18 = vld [vmem:[%s2926_s3 + $0x18] sm:$0xff]  ;;  %v18_v22 = vld [vmem:[%s2926_s3] sm:$0xff] }
   0xa   :  { %461 = vmatpush.bf16.xpose.msra.mxu0 %v1860_v4  ;;  %166 = vperm.xlu1 %1883, %v26_v6   ;;  %v1856_v19 = vld [vmem:[%s2923_s0 + $0x10] sm:$0xff]  ;;  %v61_v21 = vld [vmem:[%s2926_s3 + $0x158] sm:$0xff]  ;;  %v1855_v23 = vld [vmem:[%s2923_s0 + $0x8] sm:$0xff] }
   0xb   :  { %176 = vperm.xlu0 %1882, %v28_v5   ;;  %v59_v24 = vld [vmem:[%s2926_s3 + $0x148] sm:$0xff]  ;;  %v58_v25 = vld [vmem:[%s2926_s3 + $0x140] sm:$0xff]  ;;  %v56_v28 = vld [vmem:[%s2926_s3 + $0x130] sm:$0xff] }
   0xc   :  { %v63_v26 = vld [vmem:[%s2926_s3 + $0x168] sm:$0xff]  ;;  %v1854_v27 = vld [vmem:[%s2923_s0] sm:$0xff]  ;;  %v60_v30 = vld [vmem:[%s2926_s3 + $0x150] sm:$0xff] }
   0xd   :  { %v55_v29 = vld [vmem:[%s2926_s3 + $0x128] sm:$0xff]  ;;  %v1862_v31 = vld [vmem:[%s2924_s1] sm:$0xff]  ;;  %v57_v34 = vld [vmem:[%s2926_s3 + $0x138] sm:$0xff] }
   0xe   :  { %v30_v32 = vld [vmem:[%s2926_s3 + $0x60] sm:$0xff]  ;;  %v31_v33 = vld [vmem:[%s2926_s3 + $0x68] sm:$0xff]  ;;  %v33_v35 = vld [vmem:[%s2926_s3 + $0x78] sm:$0xff] }
   0xf   :  { %156 = vperm.xlu2 %1884, %v24_v14   ;;  %v34_v36 = vld [vmem:[%s2926_s3 + $0x80] sm:$0xff]  ;;  %v1863_v38 = vld [vmem:[%s2924_s1 + $0x8] sm:$0xff]  ;;  %v36_v39 = vld [vmem:[%s2926_s3 + $0x90] sm:$0xff] }
  0x10   :  { %v54_v37 = vld [vmem:[%s2926_s3 + $0x120] sm:$0xff]  ;;  %v37_v40 = vld [vmem:[%s2926_s3 + $0x98] sm:$0xff]  ;;  %v32_v41 = vld [vmem:[%s2926_s3 + $0x70] sm:$0xff] }
  0x11   :  { %v39_v42 = vld [vmem:[%s2926_s3 + $0xa8] sm:$0xff]  ;;  %v40_v43 = vld [vmem:[%s2926_s3 + $0xb0] sm:$0xff]  ;;  %v42_v46 = vld [vmem:[%s2926_s3 + $0xc0] sm:$0xff] }
  0x12   :  { %462 = vmatpush.bf16.xpose.msra.mxu0 %v1859_v7  ;;  %146 = vperm.xlu1 %1883, %v22_v9   ;;  %v35_v44 = vld [vmem:[%s2926_s3 + $0x88] sm:$0xff]  ;;  %v1864_v45 = vld [vmem:[%s2924_s1 + $0x10] sm:$0xff]  ;;  %v38_v48 = vld [vmem:[%s2926_s3 + $0xa0] sm:$0xff] }
  0x13   :  { %151 = vperm.xlu0 %1882, %v23_v8   ;;  %v43_v47 = vld [vmem:[%s2926_s3 + $0xc8] sm:$0xff]  ;;  %v44_v49 = vld [vmem:[%s2926_s3 + $0xd0] sm:$0xff]  ;;  %v45_v50 = vld [vmem:[%s2926_s3 + $0xd8] sm:$0xff] }
  0x14   :  { %v41_v51 = vld [vmem:[%s2926_s3 + $0xb8] sm:$0xff]  ;;  %v47_v53 = vld [vmem:[%s2926_s3 + $0xe8] sm:$0xff]  ;;  %v50_v54 = vld [vmem:[%s2926_s3 + $0x100] sm:$0xff] }
  0x15   :  { %v1865_v52 = vld [vmem:[%s2924_s1 + $0x18] sm:$0xff]  ;;  %v66_v55 = vld [vmem:[%s2926_s3 + $0x180] sm:$0xff]  ;;  %v52_v56 = vld [vmem:[%s2926_s3 + $0x110] sm:$0xff] }
  0x16   :  { %v48_v57 = vld [vmem:[%s2926_s3 + $0xf0] sm:$0xff]  ;;  %v46_v58 = vld [vmem:[%s2926_s3 + $0xe0] sm:$0xff]  ;;  %v67_v60 = vld [vmem:[%s2926_s3 + $0x188] sm:$0xff] }
  0x17   :  { %141 = vperm.xlu2 %1884, %v21_v18   ;;  %v1866_v59 = vld [vmem:[%s2924_s1 + $0x20] sm:$0xff]  ;;  %v68_v61 = vld [vmem:[%s2926_s3 + $0x190] sm:$0xff]  ;;  %v51_v62 = vld [vmem:[%s2926_s3 + $0x108] sm:$0xff] }
  0x18   :  { %v69_v63 = vld [vmem:[%s2926_s3 + $0x198] sm:$0xff]  ;;  %v70_v0 = vld [vmem:[%s2926_s3 + $0x1a0] sm:$0xff]  ;;  %v1867_v2 = vld [vmem:[%s2924_s1 + $0x28] sm:$0xff] }
  0x19   :  { %v53_v1 = vld [vmem:[%s2926_s3 + $0x118] sm:$0xff]  ;;  %v71_v4 = vld [vmem:[%s2926_s3 + $0x1a8] sm:$0xff]  ;;  %v1868_v5 = vld [vmem:[%s2924_s1 + $0x30] sm:$0xff] }
  0x1a   :  { %463 = vmatpush.bf16.xpose.msra.mxu0 %v1858_v11  ;;  %131 = vperm.xlu1 %1883, %v19_v13   ;;  %v49_v3 = vld [vmem:[%s2926_s3 + $0xf8] sm:$0xff]  ;;  %v1870_v7 = vld [vmem:[%s2924_s1 + $0x40] sm:$0xff]  ;;  %v1871_v10 = vld [vmem:[%s2924_s1 + $0x48] sm:$0xff] }
  0x1b   :  { %136 = vperm.xlu0 %1882, %v20_v12   ;;  %v1869_v6 = vld [vmem:[%s2924_s1 + $0x38] sm:$0xff]  ;;  %v1872_v13 = vld [vmem:[%s2924_s1 + $0x50] sm:$0xff] }
  0x1f   :  { %126 = vperm.xlu2 %1884, %v18_v22  }
  0x22   :  { %464 = vmatpush.bf16.xpose.msra.mxu0 %v1857_v15  ;;  %636 = vperm.xlu1 %1883, %v64_v17  }
  0x23   :  { %641 = vperm.xlu0 %1882, %v65_v16   ;;  %v1873_v16 = vld [vmem:[%s2924_s1 + $0x58] sm:$0xff] }
  0x27   :  { %631 = vperm.xlu2 %1884, %v63_v26  }
  0x2a   :  { %465 = vmatpush.bf16.xpose.msra.mxu0 %v1856_v19  ;;  %621 = vperm.xlu1 %1883, %v61_v21   ;;  %v1874_v19 = vld [vmem:[%s2924_s1 + $0x60] sm:$0xff] }
  0x2b   :  { %626 = vperm.xlu0 %1882, %v62_v20  }
  0x2f   :  { %616 = vperm.xlu2 %1884, %v60_v30  }
  0x32   :  { %466 = vmatpush.bf16.xpose.msra.mxu0 %v1855_v23  ;;  %606 = vperm.xlu1 %1883, %v58_v25  }
  0x33   :  { %611 = vperm.xlu0 %1882, %v59_v24  }
  0x37   :  { %601 = vperm.xlu2 %1884, %v57_v34  }
  0x3a   :  { %467 = vmatpush.bf16.xpose.msra.mxu0 %v1854_v27  ;;  %591 = vperm.xlu1 %1883, %v55_v29  }
  0x3b   :  { %596 = vperm.xlu0 %1882, %v56_v28   ;;  %v1875_v28 = vld [vmem:[%s2924_s1 + $0x68] sm:$0xff] }
  0x3f   :  { %586 = vperm.xlu2 %1884, %v54_v37  }
  0x41   :  { %468 = vmatmul.bf16.vlgmr.msra.gmra.mxu0 %v1862_v31 }
  0x42   :  { %191 = vperm.xlu1 %1883, %v31_v33  }
  0x43   :  { %186 = vperm.xlu0 %1882, %v30_v32  }
  0x47   :  { %196 = vperm.xlu2 %1884, %v32_v41  }
  0x4a   :  { %206 = vperm.xlu1 %1883, %v34_v36  }
  0x4b   :  { %201 = vperm.xlu0 %1882, %v33_v35  }
  0x4f   :  { %211 = vperm.xlu2 %1884, %v35_v44  }
  0x51   :  { %473 = vmatmul.bf16.gmra.mxu0 %v1863_v38 }
  0x52   :  { %221 = vperm.xlu1 %1883, %v37_v40  }
  0x53   :  { %216 = vperm.xlu0 %1882, %v36_v39  }
  0x57   :  { %226 = vperm.xlu2 %1884, %v38_v48  }
  0x5a   :  { %236 = vperm.xlu1 %1883, %v40_v43  }
  0x5b   :  { %231 = vperm.xlu0 %1882, %v39_v42  }
  0x5f   :  { %241 = vperm.xlu2 %1884, %v41_v51  }
  0x61   :  { %478 = vmatmul.bf16.gmra.mxu0 %v1864_v45  ;;  %v162_v23 = vpop.permute.xlu2 %161 }
  0x62   :  { %251 = vperm.xlu1 %1883, %v43_v47  }
  0x63   :  { %246 = vperm.xlu0 %1882, %v42_v46  }
  0x67   :  { %1325 = vperm.xlu2 %1884, %v66_v55   ;;  %v571_v55 = vld [vmem:[%s2925_s2] sm:$0xff] }
  0x69   :  { %v157_v27 = vpop.permute.xlu2 %156 }
  0x6a   :  { %261 = vperm.xlu1 %1883, %v45_v50  }
  0x6b   :  { %256 = vperm.xlu0 %1882, %v44_v49  }
  0x6f   :  { %266 = vperm.xlu2 %1884, %v46_v58  }
  0x71   :  { %483 = vmatmul.bf16.gmra.mxu0 %v1865_v52  ;;  %v142_v42 = vpop.permute.xlu2 %141 }
  0x72   :  { %286 = vperm.xlu1 %1883, %v50_v54  }
  0x73   :  { %271 = vperm.xlu0 %1882, %v47_v53  }
  0x74   :  { %v172_v22 = vpop.permute.xlu1 %171 }
  0x75   :  { %v182_v21 = vpop.permute.xlu0 %181 }
  0x77   :  { %291 = vperm.xlu2 %1884, %v51_v62  }
  0x7a   :  { %276 = vperm.xlu1 %1883, %v48_v57  }
  0x7b   :  { %296 = vperm.xlu0 %1882, %v52_v56  }
  0x7c   :  { %v167_v26 = vpop.permute.xlu1 %166 }
  0x7d   :  { %v177_v25 = vpop.permute.xlu0 %176 }
  0x7f   :  { %301 = vperm.xlu2 %1884, %v53_v1   ;;  %v646_v1 = vsel %vm644_vm0, %v571_v55, 0 }
  0x81   :  { %488 = vmatmul.bf16.gmra.mxu0 %v1866_v59 }
  0x82   :  { %1695 = vperm.xlu1 %1883, %v68_v61   ;;  %v1876_v61 = vld [vmem:[%s2924_s1 + $0x70] sm:$0xff] }
  0x83   :  { %1690 = vperm.xlu0 %1882, %v67_v60  }
  0x84   :  { %v147_v38 = vpop.permute.xlu1 %146 }
  0x85   :  { %v152_v36 = vpop.permute.xlu0 %151 }
  0x87   :  { %281 = vperm.xlu2 %1884, %v49_v3  }
  0x8a   :  { %1705 = vperm.xlu1 %1883, %v70_v0  }
  0x8b   :  { %1700 = vperm.xlu0 %1882, %v69_v63  }
  0x8d   :  { %v137_v63 = vpop.permute.xlu0 %136 }
  0x8f   :  { %1724 = vperm.xlu2 %1884, %v71_v4  }
  0x91   :  { %493 = vmatmul.bf16.gmra.mxu0 %v1867_v2  ;;  %v132_v2 = vpop.permute.xlu1 %131 }
  0xa1   :  { %498 = vmatmul.bf16.gmra.mxu0 %v1868_v5 }
  0xb1   :  { %503 = vmatmul.bf16.gmra.mxu0 %v1869_v6 }
  0xbe   :  { %v2159_v8 = vpop.f32.mrf.mxu0 }
  0xc1   :  { %508 = vmatmul.bf16.gmra.mxu0 %v1870_v7 }
  0xc6   :  { %v2161_v9 = vpop.f32.mrf.mxu0 }
  0xc7   :  { %v2222_v7 = vadd.f32 %v2161_v9, %v132_v2 }
  0xce   :  { %v2166_v11 = vpop.f32.mrf.mxu0 }
  0xcf   :  { %v475_v3 = vadd.f32 %v2166_v11, %v137_v63  ;;  %v127_v11 = vpop.permute.xlu2 %126 }
  0xd1   :  { %513 = vmatmul.bf16.gmra.mxu0 %v1871_v10 }
  0xd6   :  { %v476_v12 = vpop.f32.mrf.mxu0 }
  0xd7   :  { %v477_v56 = vadd.f32 %v476_v12, %v142_v42 }
  0xd9   :  { %v562_v10 = vmax.f32 %v477_v56, 0.0  ;;  %v573_v56 = vld [vmem:[%s2925_s2 + $0x10] sm:$0xff] }
  0xde   :  { %v479_v14 = vpop.f32.mrf.mxu0 }
  0xdf   :  { %v480_v51 = vadd.f32 %v479_v14, %v147_v38 }
  0xe1   :  { %518 = vmatmul.bf16.gmra.mxu0 %v1872_v13  ;;  %v563_v0 = vmax.f32 %v480_v51, 0.0 }
  0xe6   :  { %v481_v15 = vpop.f32.mrf.mxu0 }
  0xe7   :  { %v482_v46 = vadd.f32 %v481_v15, %v152_v36 }
  0xe9   :  { %v564_v57 = vmax.f32 %v482_v46, 0.0 }
  0xeb   :  { %v2224_v12 = vand.u32 4294901760, %v564_v57 }
  0xee   :  { %v484_v17 = vpop.f32.mrf.mxu0 }
  0xef   :  { %v485_v37 = vadd.f32 %v484_v17, %v157_v27  ;;  %v470_v17 = vadd.f32 %v2159_v8, %v127_v11  ;;  %v560_v8 = vmax.f32 %v2222_v7, 0.0 }
  0xf1   :  { %523 = vmatmul.bf16.gmra.mxu0 %v1873_v16  ;;  %v565_v47 = vmax.f32 %v485_v37, 0.0  ;;  %v2237_v16 = vand.u32 4294901760, %v646_v1  ;;  %v2277_v36 = vand.u32 4294901760, %v560_v8 }
  0xf3   :  { %v2199_v58 = vand.u32 4294901760, %v565_v47  ;;  %v2312_v63 = vsub.f32 %v560_v8, %v2277_v36 }
  0xf5   :  { %v2227_v13 = vsub.f32 %v565_v47, %v2199_v58 }
  0xf6   :  { %v486_v18 = vpop.f32.mrf.mxu0 }
  0xf7   :  { %v487_v34 = vadd.f32 %v486_v18, %v162_v23  ;;  %v2240_v18 = vand.u32 4294901760, %v563_v0  ;;  %v572_v23 = vld [vmem:[%s2925_s2 + $0x8] sm:$0xff] }
  0xf9   :  { %v566_v43 = vmax.f32 %v487_v34, 0.0 }
  0xfb   :  { %v2189_v52 = vand.u32 4294901760, %v566_v43 }
  0xfd   :  { %v2218_v5 = vsub.f32 %v566_v43, %v2189_v52 }
  0xfe   :  { %v489_v20 = vpop.f32.mrf.mxu0 }
  0xff   :  { %v490_v32 = vadd.f32 %v489_v20, %v167_v26 }
 0x101   :  { %528 = vmatmul.bf16.gmra.mxu0 %v1874_v19  ;;  %v567_v39 = vmax.f32 %v490_v32, 0.0  ;;  %v561_v19 = vmax.f32 %v475_v3, 0.0  ;;  %v559_v32 = vmax.f32 %v470_v17, 0.0  ;;  %v872_v17 = vand.u32 4294901760, %v2312_v63 }
 0x103   :  { %v2184_v48 = vand.u32 4294901760, %v567_v39  ;;  %v2293_v46 = vand.u32 4294901760, %v559_v32 }
 0x105   :  { %v2202_v59 = vsub.f32 %v567_v39, %v2184_v48  ;;  %v2325_v3 = vsub.f32 %v559_v32, %v2293_v46 }
 0x106   :  { %v491_v24 = vpop.f32.mrf.mxu0 }
 0x107   :  { %v492_v30 = vadd.f32 %v491_v24, %v172_v22  ;;  %v830_v9 = vand.u32 4294901760, %v2202_v59  ;;  %v836_v22 = vand.u32 4294901760, %v2218_v5  ;;  %v2252_v24 = vand.u32 4294901760, %v562_v10 }
 0x108   :  { %v878_v8 = vand.u32 4294901760, %v2325_v3 }
 0x109   :  { %v568_v35 = vmax.f32 %v492_v30, 0.0  ;;  %v831_v27 = vsub.f32 %v2202_v59, %v830_v9  ;;  %v2267_v30 = vsub.f32 %v563_v0, %v2240_v18  ;;  %v2281_v37 = vsub.f32 %v562_v10, %v2252_v24 }
 0x10a   :  { %v652_v10 = vsel %vm644_vm0, %v573_v56, 0 }
 0x10b   :  { %v2182_v44 = vand.u32 4294901760, %v568_v35  ;;  %v832_v39 = vand.u32 4294901760, %v831_v27  ;;  %v860_v55 = vand.u32 4294901760, %v2281_v37  ;;  %v574_v27 = vld [vmem:[%s2925_s2 + $0x18] sm:$0xff] }
 0x10d   :  { %v2194_v54 = vsub.f32 %v568_v35, %v2182_v44  ;;  %v837_v35 = vsub.f32 %v2218_v5, %v836_v22 }
 0x10e   :  { %v494_v29 = vpop.f32.mrf.mxu0 }
 0x10f   :  { %v495_v31 = vadd.f32 %v494_v29, %v177_v25  ;;  %v824_v6 = vand.u32 4294901760, %v2194_v54  ;;  %v2256_v25 = vsub.f32 %v564_v57, %v2224_v12  ;;  %v2264_v29 = vsub.f32 %v646_v1, %v2237_v16 }
 0x111   :  { %v569_v33 = vmax.f32 %v495_v31, 0.0  ;;  %533 = vmatmul.bf16.gmra.mxu0 %v1875_v28  ;;  %v842_v28 = vand.u32 4294901760, %v2227_v13  ;;  %v649_v31 = vsel %vm644_vm0, %v572_v23, 0  ;;  %v848_v38 = vand.u32 4294901760, %v2256_v25 }
 0x112   :  { %v711_v42 = vand.u32 4294901760, %v2264_v29  ;;  %v2289_v43 = vand.u32 4294901760, %v649_v31 }
 0x113   :  { %v2180_v40 = vand.u32 4294901760, %v569_v33  ;;  %v849_v51 = vsub.f32 %v2256_v25, %v848_v38 }
 0x114   :  { %v712_v0 = vsub.f32 %v2264_v29, %v711_v42  ;;  %v2318_v1 = vsub.f32 %v649_v31, %v2289_v43  ;;  %v873_v31 = vsub.f32 %v2312_v63, %v872_v17 }
 0x115   :  { %v2187_v49 = vsub.f32 %v569_v33, %v2180_v40  ;;  %v2271_v33 = vand.u32 4294901760, %v561_v19  ;;  %v850_v11 = vand.u32 4294901760, %v849_v51 }
 0x116   :  { %v496_v41 = vpop.f32.mrf.mxu0 }
 0x117   :  { %v497_v45 = vadd.f32 %v496_v41, %v182_v21  ;;  %v818_v62 = vand.u32 4294901760, %v2187_v49  ;;  %v825_v21 = vsub.f32 %v2194_v54, %v824_v6  ;;  %v843_v41 = vsub.f32 %v2227_v13, %v842_v28 }
 0x118   :  { %v2296_v47 = vsub.f32 %v561_v19, %v2271_v33  ;;  %v719_v19 = vand.u32 4294901760, %v2318_v1 }
 0x119   :  { %v570_v50 = vmax.f32 %v497_v45, 0.0  ;;  %v819_v15 = vsub.f32 %v2187_v49, %v818_v62  ;;  %v826_v34 = vand.u32 4294901760, %v825_v21  ;;  %v854_v45 = vand.u32 4294901760, %v2267_v30 }
 0x11a   :  { %v844_v57 = vand.u32 4294901760, %v843_v41  ;;  %v866_v7 = vand.u32 4294901760, %v2296_v47  ;;  %v2338_v21 = vand.u32 4294901760, %v652_v10  ;;  %v720_v32 = vsub.f32 %v2318_v1, %v719_v19 }
 0x11b   :  { %v2191_v53 = vand.u32 4294901760, %v570_v50  ;;  %v820_v26 = vand.u32 4294901760, %v819_v15  ;;  %v855_v2 = vsub.f32 %v2267_v30, %v854_v45  ;;  %v713_v15 = vand.u32 4294901760, %v712_v0 }
 0x11c   :  { %v867_v23 = vsub.f32 %v2296_v47, %v866_v7  ;;  %v655_v41 = vsel %vm644_vm0, %v574_v27, 0  ;;  %v721_v51 = vand.u32 4294901760, %v720_v32 }
 0x11d   :  { %686 = vmatpush.msra.mxu1 %v2191_v53  ;;  %v2206_v60 = vsub.f32 %v570_v50, %v2191_v53  ;;  %v838_v50 = vand.u32 4294901760, %v837_v35 }
 0x11e   :  { %v868_v35 = vand.u32 4294901760, %v867_v23 }
 0x11f   :  { %688 = vmatpush.msra.mxu1 %v2180_v40  ;;  %937 = vmatpush.msra.mxu3 %v2206_v60  ;;  %v812_v4 = vand.u32 4294901760, %v2206_v60 }
 0x121   :  { %538 = vmatmul.bf16.gmra.mxu0 %v1876_v61  ;;  %690 = vmatpush.msra.mxu1 %v2182_v44  ;;  %v813_v14 = vsub.f32 %v2206_v60, %v812_v4  ;;  %v1877_v61 = vld [vmem:[%s2924_s1 + $0x78] sm:$0xff] }
 0x122   :  { %940 = vmatpush.msra.mxu3 %v2187_v49 }
 0x123   :  { %692 = vmatpush.msra.mxu1 %v2184_v48  ;;  %v814_v20 = vand.u32 4294901760, %v813_v14  ;;  %v861_v14 = vsub.f32 %v2281_v37, %v860_v55 }
 0x124   :  { %943 = vmatpush.msra.mxu3 %v2194_v54 }
 0x125   :  { %694 = vmatpush.msra.mxu1 %v2189_v52  ;;  %815 = vmatpush.msra.mxu2 %v814_v20  ;;  %v856_v20 = vand.u32 4294901760, %v855_v2 }
 0x126   :  { %946 = vmatpush.msra.mxu3 %v2202_v59 }
 0x127   :  { %696 = vmatpush.msra.mxu1 %v2199_v58  ;;  %821 = vmatpush.msra.mxu2 %v820_v26  ;;  %v862_v26 = vand.u32 4294901760, %v861_v14 }
 0x128   :  { %949 = vmatpush.msra.mxu3 %v2218_v5 }
 0x129   :  { %698 = vmatpush.msra.mxu1 %v2224_v12  ;;  %827 = vmatpush.msra.mxu2 %v826_v34  ;;  %v2357_v34 = vsub.f32 %v652_v10, %v2338_v21 }
 0x12a   :  { %952 = vmatpush.msra.mxu3 %v2227_v13 }
 0x12b   :  { %700 = vmatpush.msra.mxu1 %v2240_v18  ;;  %833 = vmatpush.msra.mxu2 %v832_v39  ;;  %v879_v39 = vsub.f32 %v2325_v3, %v878_v8  ;;  %v727_v56 = vand.u32 4294901760, %v2357_v34 }
 0x12c   :  { %955 = vmatpush.msra.mxu3 %v2256_v25 }
 0x12d   :  { %702 = vmatpush.msra.mxu1 %v2252_v24  ;;  %839 = vmatpush.msra.mxu2 %v838_v50  ;;  %v874_v50 = vand.u32 4294901760, %v873_v31  ;;  %v728_v0 = vsub.f32 %v2357_v34, %v727_v56 }
 0x12e   :  { %958 = vmatpush.msra.mxu3 %v2267_v30 }
 0x12f   :  { %704 = vmatpush.msra.mxu1 %v2271_v33  ;;  %845 = vmatpush.msra.mxu2 %v844_v57  ;;  %v2370_v57 = vand.u32 4294901760, %v655_v41  ;;  %v729_v10 = vand.u32 4294901760, %v728_v0 }
 0x130   :  { %961 = vmatpush.msra.mxu3 %v2281_v37  ;;  %v579_v37 = vld [vmem:[%s2925_s2 + $0x40] sm:$0xff] }
 0x131   :  { %543 = vmatmul.bf16.gmra.mxu0 %v1877_v61  ;;  %706 = vmatpush.msra.mxu1 %v2277_v36  ;;  %v880_v61 = vand.u32 4294901760, %v879_v39 }
 0x132   :  { %851 = vmatpush.msra.mxu2 %v850_v11  ;;  %964 = vmatpush.msra.mxu3 %v2296_v47 }
 0x133   :  { %708 = vmatpush.msra.mxu1 %v2293_v46 }
 0x134   :  { %857 = vmatpush.msra.mxu2 %v856_v20  ;;  %967 = vmatpush.msra.mxu3 %v2312_v63 }
 0x135   :  { %714 = vmatmul.f32.vlgmr.msra.gmra.mxu1 %v713_v15 }
 0x136   :  { %1037 = vmatpush.msrb.mxu1 %v2191_v53  ;;  %863 = vmatpush.msra.mxu2 %v862_v26  ;;  %v581_v26 = vld [vmem:[%s2925_s2 + $0x50] sm:$0xff] }
 0x137   :  { %970 = vmatpush.msra.mxu3 %v2325_v3  ;;  %v580_v3 = vld [vmem:[%s2925_s2 + $0x48] sm:$0xff]  ;;  %v676_v32 = vsel %vm644_vm0, %v581_v26, 0 }
 0x138   :  { %1039 = vmatpush.msrb.mxu1 %v2180_v40  ;;  %869 = vmatpush.msra.mxu2 %v868_v35 }
 0x139   :  { %1239 = vmatpush.msrb.mxu3 %v2191_v53  ;;  %v575_v53 = vld [vmem:[%s2925_s2 + $0x20] sm:$0xff] }
 0x13a   :  { %973 = vmatmul.f32.vlgmr.msra.gmra.mxu3 %v2264_v29  ;;  %1041 = vmatpush.msrb.mxu1 %v2182_v44  ;;  %v658_v2 = vsel %vm644_vm0, %v575_v53, 0  ;;  %v2572_v29 = vpop.permute.xlu0 %641 }
 0x13b   :  { %1241 = vmatpush.msrb.mxu3 %v2180_v40  ;;  %875 = vmatpush.msra.mxu2 %v874_v50  ;;  %v1878_v40 = vld [vmem:[%s2924_s1 + $0x80] sm:$0xff]  ;;  %v2398_v14 = vand.u32 4294901760, %v658_v2  ;;  %v582_v50 = vld [vmem:[%s2925_s2 + $0x58] sm:$0xff] }
 0x13c   :  { %1043 = vmatpush.msrb.mxu1 %v2184_v48  ;;  %v679_v53 = vsel %vm644_vm0, %v582_v50, 0 }
 0x13d   :  { %1243 = vmatpush.msrb.mxu3 %v2182_v44  ;;  %881 = vmatpush.msra.mxu2 %v880_v61  ;;  %v2386_v44 = vsub.f32 %v655_v41, %v2370_v57  ;;  %v2523_v41 = vand.u32 4294901760, %v676_v32 }
 0x13e   :  { %722 = vmatmul.f32.gmra.mxu1 %v721_v51  ;;  %883 = vmatmul.f32.vlgmr.msra.gmra.mxu2 %v2237_v16 }
 0x13f   :  { %1045 = vmatpush.msrb.mxu1 %v2189_v52  ;;  %1140 = vmatpush.msrb.mxu2 %v812_v4  ;;  %v735_v11 = vand.u32 4294901760, %v2386_v44  ;;  %v1879_v4 = vld [vmem:[%s2924_s1 + $0x88] sm:$0xff]  ;;  %v2532_v61 = vsub.f32 %v676_v32, %v2523_v41 }
 0x140   :  { %1245 = vmatpush.msrb.mxu3 %v2184_v48  ;;  %v576_v48 = vld [vmem:[%s2925_s2 + $0x28] sm:$0xff] }
 0x141   :  { %1047 = vmatpush.msrb.mxu1 %v2199_v58  ;;  %1144 = vmatpush.msrb.mxu2 %v818_v62  ;;  %v736_v49 = vsub.f32 %v2386_v44, %v735_v11  ;;  %v661_v54 = vsel %vm644_vm0, %v576_v48, 0  ;;  %v577_v62 = vld [vmem:[%s2925_s2 + $0x30] sm:$0xff]  ;;  %v791_v0 = vand.u32 4294901760, %v2532_v61 }
 0x142   :  { %1247 = vmatpush.msrb.mxu3 %v2189_v52  ;;  %548 = vmatmul.bf16.gmra.mxu0 %v1878_v40  ;;  %v2416_v52 = vsub.f32 %v658_v2, %v2398_v14  ;;  %v2428_v60 = vand.u32 4294901760, %v661_v54  ;;  %v2538_v2 = vand.u32 4294901760, %v679_v53 }
 0x143   :  { %1049 = vmatpush.msrb.mxu1 %v2224_v12  ;;  %1148 = vmatpush.msrb.mxu2 %v824_v6 }
 0x144   :  { %1249 = vmatpush.msrb.mxu3 %v2199_v58  ;;  %v737_v58 = vand.u32 4294901760, %v736_v49  ;;  %v743_v59 = vand.u32 4294901760, %v2416_v52  ;;  %v2448_v6 = vsub.f32 %v661_v54, %v2428_v60  ;;  %v2544_v48 = vsub.f32 %v679_v53, %v2538_v2 }
 0x145   :  { %1051 = vmatpush.msrb.mxu1 %v2240_v18  ;;  %978 = vmatmul.f32.gmra.mxu3 %v2318_v1 }
 0x146   :  { %1152 = vmatpush.msrb.mxu2 %v830_v9  ;;  %1251 = vmatpush.msrb.mxu3 %v2224_v12  ;;  %v744_v5 = vsub.f32 %v2416_v52, %v743_v59  ;;  %v664_v12 = vsel %vm644_vm0, %v577_v62, 0  ;;  %v751_v9 = vand.u32 4294901760, %v2448_v6  ;;  %v799_v54 = vand.u32 4294901760, %v2544_v48 }
 0x147   :  { %730 = vmatmul.f32.gmra.mxu1 %v729_v10  ;;  %887 = vmatmul.f32.gmra.mxu2 %v2289_v43  ;;  %v792_v10 = vsub.f32 %v2532_v61, %v791_v0 }
 0x148   :  { %1053 = vmatpush.msrb.mxu1 %v2252_v24  ;;  %1156 = vmatpush.msrb.mxu2 %v836_v22  ;;  %v745_v13 = vand.u32 4294901760, %v744_v5  ;;  %v578_v22 = vld [vmem:[%s2925_s2 + $0x38] sm:$0xff] }
 0x149   :  { %1253 = vmatpush.msrb.mxu3 %v2240_v18  ;;  %v2459_v18 = vand.u32 4294901760, %v664_v12  ;;  %v793_v49 = vand.u32 4294901760, %v792_v10 }
 0x14a   :  { %1055 = vmatpush.msrb.mxu1 %v2271_v33  ;;  %1160 = vmatpush.msrb.mxu2 %v842_v28  ;;  %v667_v28 = vsel %vm644_vm0, %v578_v22, 0 }
 0x14b   :  { %1255 = vmatpush.msrb.mxu3 %v2252_v24  ;;  %v752_v24 = vsub.f32 %v2448_v6, %v751_v9  ;;  %v2472_v25 = vsub.f32 %v664_v12, %v2459_v18 }
 0x14c   :  { %1057 = vmatpush.msrb.mxu1 %v2277_v36  ;;  %1164 = vmatpush.msrb.mxu2 %v848_v38 }
 0x14d   :  { %1257 = vmatpush.msrb.mxu3 %v2271_v33  ;;  %v753_v30 = vand.u32 4294901760, %v752_v24  ;;  %v759_v33 = vand.u32 4294901760, %v2472_v25 }
 0x14e   :  { %1059 = vmatpush.msrb.mxu1 %v2293_v46  ;;  %1168 = vmatpush.msrb.mxu2 %v854_v45 }
 0x14f   :  { %1259 = vmatpush.msrb.mxu3 %v2277_v36  ;;  %738 = vmatmul.f32.gmra.mxu1 %v737_v58  ;;  %v2478_v36 = vand.u32 4294901760, %v667_v28  ;;  %v760_v38 = vsub.f32 %v2472_v25, %v759_v33  ;;  %v800_v58 = vsub.f32 %v2544_v48, %v799_v54 }
 0x150   :  { %891 = vmatmul.f32.gmra.mxu2 %v2338_v21  ;;  %983 = vmatmul.f32.gmra.mxu3 %v2357_v34  ;;  %v2592_v34 = vpop.permute.xlu2 %631 }
 0x151   :  { %1172 = vmatpush.msrb.mxu2 %v860_v55  ;;  %1261 = vmatpush.msrb.mxu3 %v2293_v46  ;;  %v2487_v45 = vsub.f32 %v667_v28, %v2478_v36  ;;  %v670_v46 = vsel %vm644_vm0, %v579_v37, 0  ;;  %v761_v47 = vand.u32 4294901760, %v760_v38  ;;  %v801_v62 = vand.u32 4294901760, %v800_v58 }
 0x152   :  { %553 = vmatmul.bf16.gmra.mxu0 %v1879_v4  ;;  %v2493_v63 = vand.u32 4294901760, %v670_v46 }
 0x153   :  { %1176 = vmatpush.msrb.mxu2 %v866_v7  ;;  %v767_v55 = vand.u32 4294901760, %v2487_v45 }
 0x154   :  { %v2502_v15 = vsub.f32 %v670_v46, %v2493_v63 }
 0x155   :  { %1180 = vmatpush.msrb.mxu2 %v872_v17  ;;  %v768_v7 = vsub.f32 %v2487_v45, %v767_v55  ;;  %v673_v17 = vsel %vm644_vm0, %v580_v3, 0 }
 0x156   :  { %v775_v23 = vand.u32 4294901760, %v2502_v15 }
 0x157   :  { %1184 = vmatpush.msrb.mxu2 %v878_v8  ;;  %746 = vmatmul.f32.gmra.mxu1 %v745_v13  ;;  %v769_v20 = vand.u32 4294901760, %v768_v7  ;;  %v2508_v8 = vand.u32 4294901760, %v673_v17 }
 0x158   :  { %895 = vmatmul.f32.gmra.mxu2 %v2370_v57  ;;  %988 = vmatmul.f32.gmra.mxu3 %v2386_v44  ;;  %v776_v27 = vsub.f32 %v2502_v15, %v775_v23 }
 0x159   :  { %v2517_v31 = vsub.f32 %v673_v17, %v2508_v8 }
 0x15a   :  { %v777_v35 = vand.u32 4294901760, %v776_v27 }
 0x15b   :  { %v783_v39 = vand.u32 4294901760, %v2517_v31 }
 0x15d   :  { %v784_v51 = vsub.f32 %v2517_v31, %v783_v39 }
 0x15f   :  { %754 = vmatmul.f32.gmra.mxu1 %v753_v30  ;;  %v785_v40 = vand.u32 4294901760, %v784_v51 }
 0x160   :  { %899 = vmatmul.f32.gmra.mxu2 %v2398_v14  ;;  %993 = vmatmul.f32.gmra.mxu3 %v2416_v52  ;;  %v2602_v52 = vpop.permute.xlu1 %636 }
 0x167   :  { %762 = vmatmul.f32.gmra.mxu1 %v761_v47 }
 0x168   :  { %903 = vmatmul.f32.gmra.mxu2 %v2428_v60  ;;  %998 = vmatmul.f32.gmra.mxu3 %v2448_v6 }
 0x16f   :  { %770 = vmatmul.f32.gmra.mxu1 %v769_v20 }
 0x170   :  { %907 = vmatmul.f32.gmra.mxu2 %v2459_v18  ;;  %1003 = vmatmul.f32.gmra.mxu3 %v2472_v25 }
 0x177   :  { %778 = vmatmul.f32.gmra.mxu1 %v777_v35 }
 0x178   :  { %911 = vmatmul.f32.gmra.mxu2 %v2478_v36  ;;  %1008 = vmatmul.f32.gmra.mxu3 %v2487_v45 }
 0x17f   :  { %786 = vmatmul.f32.gmra.mxu1 %v785_v40 }
 0x180   :  { %915 = vmatmul.f32.gmra.mxu2 %v2493_v63  ;;  %1013 = vmatmul.f32.gmra.mxu3 %v2502_v15 }
 0x187   :  { %794 = vmatmul.f32.gmra.mxu1 %v793_v49 }
 0x188   :  { %919 = vmatmul.f32.gmra.mxu2 %v2508_v8  ;;  %1018 = vmatmul.f32.gmra.mxu3 %v2517_v31 }
 0x18f   :  { %802 = vmatmul.f32.gmra.mxu1 %v801_v62 }
 0x190   :  { %923 = vmatmul.f32.gmra.mxu2 %v2523_v41  ;;  %1023 = vmatmul.f32.gmra.mxu3 %v2532_v61 }
 0x197   :  { %1063 = vmatmul.f32.vlgmr.msrb.gmra.mxu1 %v711_v42 }
 0x198   :  { %927 = vmatmul.f32.gmra.mxu2 %v2538_v2  ;;  %1028 = vmatmul.f32.gmra.mxu3 %v2544_v48 }
 0x19f   :  { %1069 = vmatmul.f32.gmra.mxu1 %v719_v19 }
 0x1a0   :  { %1186 = vmatmul.f32.vlgmr.msrb.gmra.mxu2 %v2237_v16  ;;  %1263 = vmatmul.f32.vlgmr.msrb.gmra.mxu3 %v2237_v16 }
 0x1a7   :  { %1075 = vmatmul.f32.gmra.mxu1 %v727_v56 }
 0x1a8   :  { %1190 = vmatmul.f32.gmra.mxu2 %v2289_v43  ;;  %1267 = vmatmul.f32.gmra.mxu3 %v2289_v43  ;;  %v2582_v43 = vpop.permute.xlu0 %626 }
 0x1af   :  { %1081 = vmatmul.f32.gmra.mxu1 %v735_v11 }
 0x1b0   :  { %1194 = vmatmul.f32.gmra.mxu2 %v2338_v21  ;;  %1271 = vmatmul.f32.gmra.mxu3 %v2338_v21  ;;  %v612_v56 = vpop.permute.xlu0 %611 }
 0x1b2   :  { %v2574_v42 = vpop.f32.mrf.mxu1 }
 0x1b7   :  { %1087 = vmatmul.f32.gmra.mxu1 %v743_v59 }
 0x1b8   :  { %1198 = vmatmul.f32.gmra.mxu2 %v2370_v57  ;;  %1275 = vmatmul.f32.gmra.mxu3 %v2370_v57  ;;  %v597_v59 = vpop.permute.xlu0 %596 }
 0x1bb   :  { %v2580_v16 = vpop.f32.mrf.mxu1 }
 0x1bd   :  { %v2586_v1 = vpop.f32.mrf.mxu3 }
 0x1bf   :  { %1093 = vmatmul.f32.gmra.mxu1 %v751_v9  ;;  %v622_v9 = vpop.permute.xlu1 %621 }
 0x1c0   :  { %1202 = vmatmul.f32.gmra.mxu2 %v2398_v14  ;;  %1279 = vmatmul.f32.gmra.mxu3 %v2398_v14  ;;  %v617_v14 = vpop.permute.xlu2 %616 }
 0x1c1   :  { %v2590_v19 = vpop.f32.mrf.mxu2 }
 0x1c4   :  { %v731_v21 = vpop.f32.mrf.mxu1 }
 0x1c5   :  { %v732_v4 = vadd.f32 %v731_v21, %v597_v59 }
 0x1c7   :  { %1099 = vmatmul.f32.gmra.mxu1 %v759_v33  ;;  %v607_v37 = vpop.permute.xlu1 %606 }
 0x1c8   :  { %1206 = vmatmul.f32.gmra.mxu2 %v2428_v60  ;;  %1283 = vmatmul.f32.gmra.mxu3 %v2428_v60  ;;  %v2598_v57 = vpop.f32.mrf.mxu3  ;;  %v602_v22 = vpop.permute.xlu2 %601 }
 0x1ca   :  { %v2600_v44 = vpop.f32.mrf.mxu2 }
 0x1cc   :  { %v739_v11 = vpop.f32.mrf.mxu1 }
 0x1cd   :  { %v740_v24 = vadd.f32 %v739_v11, %v602_v22 }
 0x1cf   :  { %1105 = vmatmul.f32.gmra.mxu1 %v767_v55 }
 0x1d0   :  { %1210 = vmatmul.f32.gmra.mxu2 %v2459_v18  ;;  %1287 = vmatmul.f32.gmra.mxu3 %v2459_v18 }
 0x1d3   :  { %v892_v5 = vpop.f32.mrf.mxu2  ;;  %v984_v6 = vpop.f32.mrf.mxu3 }
 0x1d4   :  { %v893_v60 = vadd.f32 %v892_v5, %v732_v4  ;;  %v747_v12 = vpop.f32.mrf.mxu1 }
 0x1d5   :  { %v748_v38 = vadd.f32 %v747_v12, %v607_v37 }
 0x1d6   :  { %v2608_v13 = vadd.f32 %v984_v6, %v893_v60  ;;  %v587_v6 = vpop.permute.xlu2 %586 }
 0x1d7   :  { %1111 = vmatmul.f32.gmra.mxu1 %v775_v23  ;;  %v716_v60 = vadd.f32 %v2574_v42, %v587_v6 }
 0x1d8   :  { %1214 = vmatmul.f32.gmra.mxu2 %v2478_v36  ;;  %1291 = vmatmul.f32.gmra.mxu3 %v2478_v36 }
 0x1d9   :  { %v885_v22 = vadd.f32 %v2590_v19, %v716_v60 }
 0x1db   :  { %v896_v25 = vpop.f32.mrf.mxu2  ;;  %v989_v18 = vpop.f32.mrf.mxu3 }
 0x1dc   :  { %v897_v28 = vadd.f32 %v896_v25, %v740_v24  ;;  %v755_v30 = vpop.f32.mrf.mxu1 }
 0x1dd   :  { %v756_v3 = vadd.f32 %v755_v30, %v612_v56 }
 0x1de   :  { %v2614_v33 = vadd.f32 %v989_v18, %v897_v28  ;;  %v592_v28 = vpop.permute.xlu1 %591 }
 0x1df   :  { %1117 = vmatmul.f32.gmra.mxu1 %v783_v39  ;;  %v724_v30 = vadd.f32 %v2580_v16, %v592_v28 }
 0x1e0   :  { %1218 = vmatmul.f32.gmra.mxu2 %v2493_v63  ;;  %1295 = vmatmul.f32.gmra.mxu3 %v2493_v63 }
 0x1e1   :  { %v889_v42 = vadd.f32 %v2600_v44, %v724_v30 }
 0x1e3   :  { %v900_v45 = vpop.f32.mrf.mxu2  ;;  %v994_v46 = vpop.f32.mrf.mxu3  ;;  %v980_v19 = vadd.f32 %v2598_v57, %v889_v42 }
 0x1e4   :  { %v901_v36 = vadd.f32 %v900_v45, %v748_v38  ;;  %v763_v47 = vpop.f32.mrf.mxu1 }
 0x1e5   :  { %v764_v23 = vadd.f32 %v763_v47, %v617_v14 }
 0x1e6   :  { %v2620_v55 = vadd.f32 %v994_v46, %v901_v36 }
 0x1e7   :  { %1123 = vmatmul.f32.gmra.mxu1 %v791_v0 }
 0x1e8   :  { %1222 = vmatmul.f32.gmra.mxu2 %v2508_v8  ;;  %1299 = vmatmul.f32.gmra.mxu3 %v2508_v8 }
 0x1eb   :  { %v904_v7 = vpop.f32.mrf.mxu2  ;;  %v999_v15 = vpop.f32.mrf.mxu3 }
 0x1ec   :  { %v905_v17 = vadd.f32 %v904_v7, %v756_v3  ;;  %v771_v63 = vpop.f32.mrf.mxu1 }
 0x1ed   :  { %v772_v35 = vadd.f32 %v771_v63, %v622_v9 }
 0x1ee   :  { %v2626_v20 = vadd.f32 %v999_v15, %v905_v17 }
 0x1ef   :  { %1129 = vmatmul.f32.gmra.mxu1 %v799_v54 }
 0x1f0   :  { %1226 = vmatmul.f32.gmra.mxu2 %v2523_v41  ;;  %1303 = vmatmul.f32.gmra.mxu3 %v2523_v41 }
 0x1f3   :  { %v908_v26 = vpop.f32.mrf.mxu2  ;;  %v1004_v27 = vpop.f32.mrf.mxu3 }
 0x1f4   :  { %v909_v31 = vadd.f32 %v908_v26, %v764_v23  ;;  %v779_v32 = vpop.f32.mrf.mxu1 }
 0x1f5   :  { %v780_v41 = vadd.f32 %v779_v32, %v2582_v43 }
 0x1f6   :  { %v2632_v8 = vadd.f32 %v1004_v27, %v909_v31 }
 0x1f8   :  { %1230 = vmatmul.f32.gmra.mxu2 %v2538_v2  ;;  %1307 = vmatmul.f32.gmra.mxu3 %v2538_v2 }
 0x1fb   :  { %v912_v39 = vpop.f32.mrf.mxu2  ;;  %v1009_v50 = vpop.f32.mrf.mxu3 }
 0x1fc   :  { %v913_v51 = vadd.f32 %v912_v39, %v772_v35  ;;  %v787_v61 = vpop.f32.mrf.mxu1 }
 0x1fd   :  { %v788_v54 = vadd.f32 %v787_v61, %v2592_v34 }
 0x1fe   :  { %v2636_v53 = vadd.f32 %v1009_v50, %v913_v51 }
 0x203   :  { %v916_v40 = vpop.f32.mrf.mxu2  ;;  %v1014_v0 = vpop.f32.mrf.mxu3 }
 0x204   :  { %v917_v10 = vadd.f32 %v916_v40, %v780_v41  ;;  %v795_v48 = vpop.f32.mrf.mxu1 }
 0x205   :  { %v796_v11 = vadd.f32 %v795_v48, %v2602_v52  ;;  %v975_v52 = vadd.f32 %v2586_v1, %v885_v22 }
 0x206   :  { %v2639_v49 = vadd.f32 %v1014_v0, %v917_v10 }
 0x20b   :  { %v920_v58 = vpop.f32.mrf.mxu2  ;;  %v1019_v62 = vpop.f32.mrf.mxu3 }
 0x20c   :  { %v921_v2 = vadd.f32 %v920_v58, %v788_v54  ;;  %v803_v21 = vpop.f32.mrf.mxu1 }
 0x20d   :  { %v804_v12 = vadd.f32 %v803_v21, %v2572_v29  ;;  %v2669_v21 = vpop.f32.mrf.mxu0 }
 0x20e   :  { %v2642_v56 = vadd.f32 %v1019_v62, %v921_v2 }
 0x213   :  { %v924_v14 = vpop.f32.mrf.mxu2  ;;  %v1024_v59 = vpop.f32.mrf.mxu3 }
 0x214   :  { %v925_v4 = vadd.f32 %v924_v14, %v796_v11  ;;  %v1064_v43 = vpop.f32.mrf.mxu1 }
 0x215   :  { %v1065_v37 = vadd.f32 %v1064_v43, %v975_v52  ;;  %v2671_v6 = vpop.f32.mrf.mxu0 }
 0x216   :  { %v2645_v5 = vadd.f32 %v1024_v59, %v925_v4 }
 0x21b   :  { %v928_v34 = vpop.f32.mrf.mxu2  ;;  %v1029_v9 = vpop.f32.mrf.mxu3 }
 0x21c   :  { %v929_v24 = vadd.f32 %v928_v34, %v804_v12  ;;  %v1070_v25 = vpop.f32.mrf.mxu1 }
 0x21d   :  { %v1071_v3 = vadd.f32 %v1070_v25, %v980_v19 }
 0x21e   :  { %v2650_v18 = vadd.f32 %v1029_v9, %v929_v24 }
 0x223   :  { %v1187_v38 = vpop.f32.mrf.mxu2  ;;  %v1264_v45 = vpop.f32.mrf.mxu3 }
 0x224   :  { %v1188_v46 = vadd.f32 %v1187_v38, %v1065_v37  ;;  %v1076_v29 = vpop.f32.mrf.mxu1  ;;  %v2678_v38 = vpop.f32.mrf.mxu0 }
 0x225   :  { %v1077_v36 = vadd.f32 %v1076_v29, %v2608_v13 }
 0x226   :  { %v2656_v47 = vadd.f32 %v1264_v45, %v1188_v46 }
 0x22b   :  { %v1191_v7 = vpop.f32.mrf.mxu2  ;;  %v1268_v15 = vpop.f32.mrf.mxu3 }
 0x22c   :  { %v1192_v1 = vadd.f32 %v1191_v7, %v1071_v3  ;;  %v1082_v17 = vpop.f32.mrf.mxu1 }
 0x22d   :  { %v1083_v16 = vadd.f32 %v1082_v17, %v2614_v33 }
 0x22e   :  { %v2660_v63 = vadd.f32 %v1268_v15, %v1192_v1 }
 0x233   :  { %v1195_v23 = vpop.f32.mrf.mxu2  ;;  %v1272_v26 = vpop.f32.mrf.mxu3 }
 0x234   :  { %v1196_v44 = vadd.f32 %v1195_v23, %v1077_v36  ;;  %v1088_v27 = vpop.f32.mrf.mxu1 }
 0x235   :  { %v1089_v31 = vadd.f32 %v1088_v27, %v2620_v55 }
 0x236   :  { %v2663_v13 = vadd.f32 %v1272_v26, %v1196_v44 }
 0x23b   :  { %v1199_v32 = vpop.f32.mrf.mxu2  ;;  %v1276_v35 = vpop.f32.mrf.mxu3 }
 0x23c   :  { %v1200_v57 = vadd.f32 %v1199_v32, %v1083_v16  ;;  %v1094_v39 = vpop.f32.mrf.mxu1  ;;  %v2686_v32 = vpop.f32.mrf.mxu0 }
 0x23e   :  { %v2665_v50 = vadd.f32 %v1276_v35, %v1200_v57 }
 0x243   :  { %v1203_v51 = vpop.f32.mrf.mxu2  ;;  %v1280_v61 = vpop.f32.mrf.mxu3 }
 0x244   :  { %v1204_v41 = vadd.f32 %v1203_v51, %v1089_v31  ;;  %v1100_v33 = vpop.f32.mrf.mxu1 }
 0x245   :  { %v1101_v37 = vadd.f32 %v1100_v33, %v2632_v8 }
 0x246   :  { %v2667_v40 = vadd.f32 %v1280_v61, %v1204_v41 }
 0x24b   :  { %v1207_v0 = vpop.f32.mrf.mxu2  ;;  %v1284_v10 = vpop.f32.mrf.mxu3 }
 0x24c   :  { %v1106_v48 = vpop.f32.mrf.mxu1 }
 0x24d   :  { %v1107_v52 = vadd.f32 %v1106_v48, %v2636_v53 }
 0x253   :  { %v1211_v54 = vpop.f32.mrf.mxu2  ;;  %v1288_v58 = vpop.f32.mrf.mxu3 }
 0x254   :  { %v1112_v55 = vpop.f32.mrf.mxu1  ;;  %v1212_v29 = vadd.f32 %v1211_v54, %v1101_v37 }
 0x255   :  { %v1113_v34 = vadd.f32 %v1112_v55, %v2639_v49  ;;  %v1095_v49 = vadd.f32 %v1094_v39, %v2626_v20  ;;  %v583_v39 = vld [vmem:[%s2925_s2 + $0x60] sm:$0x7]  ;;  %s1920_s2 = smov [#allocation2]  }
 0x256   :  { %v1289_v15 = vadd.f32 %v1288_v58, %v1212_v29  ;;  %v1329_v55 = vsel %vm644_vm0, %v583_v39, 0  ;;  %v1311_v29 = vmax.f32 %v2656_v47, 0.0  ;;  %s1735_s11 = sshll.u32 %s1920_s2, 4  ;;  %s1736_s11 = int_to_ptr.vmem [resolvable:$true] %s1735_s11 }
 0x257   :  { %v1208_v19 = vadd.f32 %v1207_v0, %v1095_v49  ;;  %v1315_v0 = vmax.f32 %v2667_v40, 0.0 }
 0x258   :  { %v1317_v20 = vmax.f32 %v1289_v15, 0.0  ;;  %v2788_v15 = vand.u32 4294901760, %v1311_v29 }
 0x259   :  { %v1285_v26 = vadd.f32 %v1284_v10, %v1208_v19 }
 0x25a   :  { %v2704_v10 = vand.u32 4294901760, %v1317_v20  ;;  %v2813_v39 = vsub.f32 %v1311_v29, %v2788_v15 }
 0x25b   :  { %v1215_v62 = vpop.f32.mrf.mxu2  ;;  %v1292_v2 = vpop.f32.mrf.mxu3  ;;  %v1316_v51 = vmax.f32 %v1285_v26, 0.0 }
 0x25c   :  { %v1118_v11 = vpop.f32.mrf.mxu1  ;;  %v1216_v45 = vadd.f32 %v1215_v62, %v1107_v52  ;;  %v1314_v62 = vmax.f32 %v2665_v50, 0.0 }
 0x25d   :  { %v1119_v12 = vadd.f32 %v1118_v11, %v2642_v56 }
 0x25e   :  { %v1293_v3 = vadd.f32 %v1292_v2, %v1216_v45  ;;  %v2716_v2 = vand.u32 4294901760, %v1316_v51 }
 0x260   :  { %v1318_v44 = vmax.f32 %v1293_v3, 0.0 }
 0x262   :  { %v2696_v61 = vand.u32 4294901760, %v1318_v44 }
 0x263   :  { %v1219_v14 = vpop.f32.mrf.mxu2  ;;  %v1296_v59 = vpop.f32.mrf.mxu3 }
 0x264   :  { %v1124_v60 = vpop.f32.mrf.mxu1  ;;  %v1220_v28 = vadd.f32 %v1219_v14, %v1113_v34  ;;  %v2719_v40 = vsub.f32 %v1318_v44, %v2696_v61  ;;  %v1313_v34 = vmax.f32 %v2663_v13, 0.0  ;;  %v1312_v13 = vmax.f32 %v2660_v63, 0.0 }
 0x265   :  { %v1125_v9 = vadd.f32 %v1124_v60, %v2645_v5 }
 0x266   :  { %v1297_v36 = vadd.f32 %v1296_v59, %v1220_v28  ;;  %v2725_v59 = vand.u32 4294901760, %v1315_v0  ;;  %v1398_v28 = vand.u32 4294901760, %v2719_v40  ;;  %v2779_v19 = vand.u32 4294901760, %v1312_v13 }
 0x268   :  { %v1319_v8 = vmax.f32 %v1297_v36, 0.0  ;;  %v2760_v37 = vsub.f32 %v1315_v0, %v2725_v59  ;;  %v1399_v36 = vsub.f32 %v2719_v40, %v1398_v28  ;;  %v2800_v26 = vsub.f32 %v1312_v13, %v2779_v19 }
 0x26a   :  { %v2688_v35 = vand.u32 4294901760, %v1319_v8 }
 0x26b   :  { %v1223_v4 = vpop.f32.mrf.mxu2  ;;  %v1300_v43 = vpop.f32.mrf.mxu3 }
 0x26c   :  { %v1224_v22 = vadd.f32 %v1223_v4, %v1119_v12  ;;  %v1130_v56 = vpop.f32.mrf.mxu1  ;;  %v2707_v48 = vsub.f32 %v1319_v8, %v2688_v35  ;;  %v2727_v4 = vand.u32 4294901760, %v1329_v55 }
 0x26d   :  { %v1131_v7 = vadd.f32 %v1130_v56, %v2650_v18  ;;  %v2768_v56 = vand.u32 4294901760, %v1313_v34 }
 0x26e   :  { %v1301_v42 = vadd.f32 %v1300_v43, %v1224_v22  ;;  %v2730_v43 = vsub.f32 %v1317_v20, %v2704_v10  ;;  %v1392_v12 = vand.u32 4294901760, %v2707_v48  ;;  %v2744_v22 = vpop.f32.mrf.mxu0 }
 0x270   :  { %v1320_v53 = vmax.f32 %v1301_v42, 0.0  ;;  %v1393_v42 = vsub.f32 %v2707_v48, %v1392_v12 }
 0x272   :  { %v2684_v27 = vand.u32 4294901760, %v1320_v53  ;;  %v1394_v3 = vand.u32 4294901760, %v1393_v42 }
 0x273   :  { %v1227_v24 = vpop.f32.mrf.mxu2  ;;  %v1304_v25 = vpop.f32.mrf.mxu3 }
 0x274   :  { %v1228_v30 = vadd.f32 %v1227_v24, %v1125_v9  ;;  %v2699_v41 = vsub.f32 %v1320_v53, %v2684_v27  ;;  %v2742_v9 = vand.u32 4294901760, %v1314_v62  ;;  %v2747_v24 = vsub.f32 %v1316_v51, %v2716_v2 }
 0x275   :  { %v1416_v53 = vand.u32 4294901760, %v2760_v37 }
 0x276   :  { %v1305_v46 = vadd.f32 %v1304_v25, %v1228_v30  ;;  %v1386_v14 = vand.u32 4294901760, %v2699_v41  ;;  %v2757_v30 = vsub.f32 %v1329_v55, %v2727_v4  ;;  %v2772_v63 = vsub.f32 %v1314_v62, %v2742_v9 }
 0x278   :  { %v1321_v5 = vmax.f32 %v1305_v46, 0.0  ;;  %v1387_v52 = vsub.f32 %v2699_v41, %v1386_v14  ;;  %v1404_v46 = vand.u32 4294901760, %v2730_v43  ;;  %v1361_v47 = vand.u32 4294901760, %v2757_v30 }
 0x27a   :  { %v2682_v16 = vand.u32 4294901760, %v1321_v5  ;;  %v1388_v49 = vand.u32 4294901760, %v1387_v52  ;;  %v1362_v44 = vsub.f32 %v2757_v30, %v1361_v47 }
 0x27b   :  { %v1231_v1 = vpop.f32.mrf.mxu2  ;;  %v1308_v17 = vpop.f32.mrf.mxu3 }
 0x27c   :  { %v1232_v23 = vadd.f32 %v1231_v1, %v1131_v7  ;;  %v2691_v18 = vsub.f32 %v1321_v5, %v2682_v16  ;;  %v1410_v5 = vand.u32 4294901760, %v2747_v24  ;;  %v1405_v7 = vsub.f32 %v2730_v43, %v1404_v46 }
 0x27d   :  { %v2791_v1 = vsub.f32 %v1313_v34, %v2768_v56  ;;  %v1363_v62 = vand.u32 4294901760, %v1362_v44 }
 0x27e   :  { %v1309_v31 = vadd.f32 %v1308_v17, %v1232_v23  ;;  %v1380_v58 = vand.u32 4294901760, %v2691_v18  ;;  %v1400_v17 = vand.u32 4294901760, %v1399_v36  ;;  %v1411_v8 = vsub.f32 %v2747_v24, %v1410_v5 }
 0x27f   :  { %v1422_v23 = vand.u32 4294901760, %v2772_v63  ;;  %v1406_v20 = vand.u32 4294901760, %v1405_v7  ;;  %v1428_v51 = vand.u32 4294901760, %v2791_v1 }
 0x280   :  { %v1322_v57 = vmax.f32 %v1309_v31, 0.0  ;;  %v1381_v60 = vsub.f32 %v2691_v18, %v1380_v58  ;;  %v2806_v31 = vpop.f32.mrf.mxu0  ;;  %v1412_v0 = vand.u32 4294901760, %v1411_v8 }
 0x281   :  { %v1423_v55 = vsub.f32 %v2772_v63, %v1422_v23  ;;  %v1429_v34 = vsub.f32 %v2791_v1, %v1428_v51 }
 0x282   :  { %v2701_v33 = vand.u32 4294901760, %v1322_v57  ;;  %v1382_v45 = vand.u32 4294901760, %v1381_v60 }
 0x283   :  { %v1424_v52 = vand.u32 4294901760, %v1423_v55 }
 0x284   :  { %v2710_v54 = vsub.f32 %v1322_v57, %v2701_v33  ;;  %1336 = vmatpush.msra.mxu1 %v2701_v33  ;;  %v1417_v57 = vsub.f32 %v2760_v37, %v1416_v53 }
 0x286   :  { %v1374_v11 = vand.u32 4294901760, %v2710_v54  ;;  %1338 = vmatpush.msra.mxu1 %v2682_v16  ;;  %1455 = vmatpush.msra.mxu3 %v2710_v54  ;;  %v1418_v60 = vand.u32 4294901760, %v1417_v57 }
 0x288   :  { %v1375_v50 = vsub.f32 %v2710_v54, %v1374_v11  ;;  %1340 = vmatpush.msra.mxu1 %v2684_v27  ;;  %1458 = vmatpush.msra.mxu3 %v2691_v18  ;;  %v2835_v29 = vpop.f32.mrf.mxu0  ;;  %v192_v54 = vpop.permute.xlu1 %191 }
 0x28a   :  { %1342 = vmatpush.msra.mxu1 %v2688_v35  ;;  %1461 = vmatpush.msra.mxu3 %v2699_v41  ;;  %v1376_v25 = vand.u32 4294901760, %v1375_v50  ;;  %v1434_v50 = vand.u32 4294901760, %v2800_v26 }
 0x28c   :  { %1344 = vmatpush.msra.mxu1 %v2696_v61  ;;  %1377 = vmatpush.msra.mxu2 %v1376_v25  ;;  %v1440_v25 = vand.u32 4294901760, %v2813_v39  ;;  %v1435_v13 = vsub.f32 %v2800_v26, %v1434_v50 }
 0x28d   :  { %1464 = vmatpush.msra.mxu3 %v2707_v48  ;;  %v187_v48 = vpop.permute.xlu0 %186 }
 0x28e   :  { %1346 = vmatpush.msra.mxu1 %v2704_v10  ;;  %1383 = vmatpush.msra.mxu2 %v1382_v45  ;;  %v1430_v45 = vand.u32 4294901760, %v1429_v34  ;;  %v1441_v42 = vsub.f32 %v2813_v39, %v1440_v25 }
 0x28f   :  { %1467 = vmatpush.msra.mxu3 %v2719_v40 }
 0x290   :  { %1348 = vmatpush.msra.mxu1 %v2716_v2  ;;  %1389 = vmatpush.msra.mxu2 %v1388_v49  ;;  %v1436_v49 = vand.u32 4294901760, %v1435_v13  ;;  %v1442_v36 = vand.u32 4294901760, %v1441_v42  ;;  %v207_v40 = vpop.permute.xlu1 %206 }
 0x291   :  { %1470 = vmatpush.msra.mxu3 %v2730_v43  ;;  %v510_v42 = vadd.f32 %v2744_v22, %v207_v40 }
 0x292   :  { %1350 = vmatpush.msra.mxu1 %v2725_v59  ;;  %1395 = vmatpush.msra.mxu2 %v1394_v3 }
 0x293   :  { %1473 = vmatpush.msra.mxu3 %v2747_v24 }
 0x294   :  { %1352 = vmatpush.msra.mxu1 %v2742_v9  ;;  %1401 = vmatpush.msra.mxu2 %v1400_v17 }
 0x295   :  { %1476 = vmatpush.msra.mxu3 %v2760_v37 }
 0x296   :  { %1354 = vmatpush.msra.mxu1 %v2768_v56  ;;  %1407 = vmatpush.msra.mxu2 %v1406_v20 }
 0x297   :  { %1479 = vmatpush.msra.mxu3 %v2772_v63 }
 0x298   :  { %1356 = vmatpush.msra.mxu1 %v2779_v19  ;;  %1413 = vmatpush.msra.mxu2 %v1412_v0  ;;  %v222_v43 = vpop.permute.xlu1 %221 }
 0x299   :  { %1482 = vmatpush.msra.mxu3 %v2791_v1 }
 0x29a   :  { %1358 = vmatpush.msra.mxu1 %v2788_v15  ;;  %1419 = vmatpush.msra.mxu2 %v1418_v60 }
 0x29b   :  { %1485 = vmatpush.msra.mxu3 %v2800_v26  ;;  %1364 = vmatmul.f32.vlgmr.msra.gmra.mxu1 %v1363_v62  ;;  %v500_v62 = vadd.f32 %v2669_v21, %v187_v48 }
 0x29c   :  { %1500 = vmatpush.msrb.mxu1 %v2701_v33  ;;  %1425 = vmatpush.msra.mxu2 %v1424_v52 }
 0x29d   :  { %1488 = vmatpush.msra.mxu3 %v2813_v39 }
 0x29e   :  { %1502 = vmatpush.msrb.mxu1 %v2682_v16  ;;  %1431 = vmatpush.msra.mxu2 %v1430_v45 }
 0x29f   :  { %1592 = vmatpush.msrb.mxu3 %v2701_v33 }
 0x2a0   :  { %1491 = vmatmul.f32.vlgmr.msra.gmra.mxu3 %v2757_v30  ;;  %1504 = vmatpush.msrb.mxu1 %v2684_v27 }
 0x2a1   :  { %1594 = vmatpush.msrb.mxu3 %v2682_v16  ;;  %1437 = vmatpush.msra.mxu2 %v1436_v49  ;;  %v2853_v16 = vpop.f32.mrf.mxu0 }
 0x2a2   :  { %1506 = vmatpush.msrb.mxu1 %v2688_v35 }
 0x2a3   :  { %1596 = vmatpush.msrb.mxu3 %v2684_v27  ;;  %1443 = vmatpush.msra.mxu2 %v1442_v36 }
 0x2a4   :  { %1445 = vmatmul.f32.vlgmr.msra.gmra.mxu2 %v2727_v4  ;;  %1508 = vmatpush.msrb.mxu1 %v2696_v61 }
 0x2a5   :  { %1537 = vmatpush.msrb.mxu2 %v1374_v11  ;;  %1598 = vmatpush.msrb.mxu3 %v2688_v35 }
 0x2a6   :  { %1510 = vmatpush.msrb.mxu1 %v2704_v10 }
 0x2a7   :  { %1541 = vmatpush.msrb.mxu2 %v1380_v58  ;;  %1600 = vmatpush.msrb.mxu3 %v2696_v61 }
 0x2a8   :  { %1512 = vmatpush.msrb.mxu1 %v2716_v2 }
 0x2a9   :  { %1545 = vmatpush.msrb.mxu2 %v1386_v14  ;;  %1602 = vmatpush.msrb.mxu3 %v2704_v10  ;;  %v2875_v27 = vpop.f32.mrf.mxu0  ;;  %v197_v14 = vpop.permute.xlu2 %196 }
 0x2aa   :  { %1514 = vmatpush.msrb.mxu1 %v2725_v59  ;;  %v505_v52 = vadd.f32 %v2678_v38, %v197_v14 }
 0x2ab   :  { %1549 = vmatpush.msrb.mxu2 %v1392_v12  ;;  %1604 = vmatpush.msrb.mxu3 %v2716_v2  ;;  %v202_v2 = vpop.permute.xlu0 %201 }
 0x2ac   :  { %1516 = vmatpush.msrb.mxu1 %v2742_v9  ;;  %v507_v13 = vadd.f32 %v2686_v32, %v202_v2 }
 0x2ad   :  { %1553 = vmatpush.msrb.mxu2 %v1398_v28  ;;  %1606 = vmatpush.msrb.mxu3 %v2725_v59 }
 0x2ae   :  { %1518 = vmatpush.msrb.mxu1 %v2768_v56 }
 0x2af   :  { %1557 = vmatpush.msrb.mxu2 %v1404_v46  ;;  %1608 = vmatpush.msrb.mxu3 %v2742_v9 }
 0x2b0   :  { %1520 = vmatpush.msrb.mxu1 %v2779_v19 }
 0x2b1   :  { %1561 = vmatpush.msrb.mxu2 %v1410_v5  ;;  %1610 = vmatpush.msrb.mxu3 %v2768_v56  ;;  %v521_v35 = vpop.f32.mrf.mxu0  ;;  %v212_v9 = vpop.permute.xlu2 %211 }
 0x2b2   :  { %1522 = vmatpush.msrb.mxu1 %v2788_v15  ;;  %v512_v49 = vadd.f32 %v2806_v31, %v212_v9 }
 0x2b3   :  { %1565 = vmatpush.msrb.mxu2 %v1416_v53  ;;  %1612 = vmatpush.msrb.mxu3 %v2779_v19  ;;  %v217_v59 = vpop.permute.xlu0 %216 }
 0x2b4   :  { %1526 = vmatmul.f32.vlgmr.msrb.gmra.mxu1 %v1361_v47  ;;  %v515_v36 = vadd.f32 %v2835_v29, %v217_v59 }
 0x2b5   :  { %1569 = vmatpush.msrb.mxu2 %v1422_v23  ;;  %1614 = vmatpush.msrb.mxu3 %v2788_v15 }
 0x2b6   :  { %1616 = vmatmul.f32.vlgmr.msrb.gmra.mxu3 %v2727_v4 }
 0x2b7   :  { %1573 = vmatpush.msrb.mxu2 %v1428_v51 }
 0x2b9   :  { %1577 = vmatpush.msrb.mxu2 %v1434_v50  ;;  %v524_v18 = vpop.f32.mrf.mxu0  ;;  %v227_v30 = vpop.permute.xlu2 %226 }
 0x2ba   :  { %v520_v21 = vadd.f32 %v2875_v27, %v227_v30 }
 0x2bb   :  { %1581 = vmatpush.msrb.mxu2 %v1440_v25  ;;  %v232_v24 = vpop.permute.xlu0 %231  ;;  %v502_v25 = vadd.f32 %v2671_v6, %v192_v54 }
 0x2bc   :  { %1583 = vmatmul.f32.vlgmr.msrb.gmra.mxu2 %v2727_v4  ;;  %v237_v4 = vpop.permute.xlu1 %236  ;;  %v522_v48 = vadd.f32 %v521_v35, %v232_v24 }
 0x2c1   :  { %v526_v61 = vpop.f32.mrf.mxu0  ;;  %v242_v63 = vpop.permute.xlu2 %241 }
 0x2c2   :  { %v527_v6 = vadd.f32 %v526_v61, %v242_v63 }
 0x2c3   :  { %v247_v37 = vpop.permute.xlu0 %246 }
 0x2c4   :  { %v252_v46 = vpop.permute.xlu1 %251 }
 0x2c9   :  { %v529_v41 = vpop.f32.mrf.mxu0  ;;  %v1326_v3 = vpop.permute.xlu2 %1325 }
 0x2ca   :  { %v530_v54 = vadd.f32 %v529_v41, %v247_v37 }
 0x2cb   :  { %v257_v5 = vpop.permute.xlu0 %256 }
 0x2cc   :  { %v262_v19 = vpop.permute.xlu1 %261 }
 0x2d1   :  { %v531_v33 = vpop.f32.mrf.mxu0  ;;  %v2900_v8 = vpop.permute.xlu2 %266 }
 0x2d2   :  { %v532_v38 = vadd.f32 %v531_v33, %v252_v46 }
 0x2d3   :  { %v2898_v7 = vpop.permute.xlu0 %271 }
 0x2d4   :  { %v287_v15 = vpop.permute.xlu1 %286 }
 0x2d9   :  { %v534_v10 = vpop.f32.mrf.mxu0  ;;  %v292_v34 = vpop.permute.xlu2 %291 }
 0x2da   :  { %v535_v14 = vadd.f32 %v534_v10, %v257_v5 }
 0x2db   :  { %v297_v57 = vpop.permute.xlu0 %296 }
 0x2dc   :  { %v2902_v51 = vpop.permute.xlu1 %276 }
 0x2e1   :  { %v536_v58 = vpop.f32.mrf.mxu0 }
 0x2e2   :  { %v537_v32 = vadd.f32 %v536_v58, %v262_v19  ;;  %v302_v19 = vpop.permute.xlu2 %301 }
 0x2e3   :  { %v1691_v59 = vpop.permute.xlu0 %1690 }
 0x2e4   :  { %v1696_v41 = vpop.permute.xlu1 %1695 }
 0x2e9   :  { %v2890_v11 = vpop.f32.mrf.mxu0 }
 0x2f1   :  { %v2892_v12 = vpop.f32.mrf.mxu0 }
 0x2f9   :  { %v2894_v28 = vpop.f32.mrf.mxu0 }
 0x301   :  { %v2896_v56 = vpop.f32.mrf.mxu0 }
 0x309   :  { %v549_v47 = vpop.f32.mrf.mxu0 }
 0x30a   :  { %v550_v22 = vadd.f32 %v549_v47, %v287_v15 }
 0x311   :  { %v551_v1 = vpop.f32.mrf.mxu0 }
 0x318   :  { %v1365_v53 = vpop.f32.mrf.mxu1 }
 0x319   :  { %v1366_v23 = vadd.f32 %v1365_v53, %v1326_v3  ;;  %v554_v0 = vpop.f32.mrf.mxu0  ;;  %v552_v3 = vadd.f32 %v551_v1, %v292_v34  ;;  %v517_v53 = vadd.f32 %v2853_v16, %v222_v43 }
 0x31a   :  { %v555_v40 = vadd.f32 %v554_v0, %v297_v57 }
 0x31b   :  { %v1621_v31 = vmax.f32 %v552_v3, 0.0 }
 0x321   :  { %v556_v33 = vpop.f32.mrf.mxu0 }
 0x322   :  { %v557_v57 = vadd.f32 %v556_v33, %v302_v19 }
 0x323   :  { %v1492_v26 = vpop.f32.mrf.mxu3 }
 0x327   :  { %v1446_v17 = vpop.f32.mrf.mxu2 }
 0x328   :  { %v1447_v44 = vadd.f32 %v1446_v17, %v1366_v23  ;;  %v525_v23 = vadd.f32 %v524_v18, %v237_v4 }
 0x32a   :  { %v1493_v39 = vadd.f32 %v1492_v26, %v1447_v44 }
 0x331   :  { %v1527_v20 = vpop.f32.mrf.mxu1 }
 0x332   :  { %v1528_v55 = vadd.f32 %v1527_v20, %v1493_v39  ;;  %v1620_v20 = vmax.f32 %v550_v22, 0.0  ;;  %v540_v22 = vadd.f32 %v2890_v11, %v2900_v8  ;;  %v282_v8 = vpop.permute.xlu2 %281 }
 0x339   :  { %v1617_v60 = vpop.f32.mrf.mxu3 }
 0x33f   :  { %v1584_v50 = vpop.f32.mrf.mxu2 }
 0x340   :  { %v1585_v45 = vadd.f32 %v1584_v50, %v1528_v55  ;;  %v1622_v50 = vmax.f32 %v555_v40, 0.0 }
 0x342   :  { %v1618_v17 = vadd.f32 %v1617_v60, %v1585_v45  ;;  %v1709_v60 = vmul.f32 %v1696_v41, %v1621_v31  ;;  %v542_v31 = vadd.f32 %v2892_v12, %v2898_v7  ;;  %v547_v12 = vadd.f32 %v2896_v56, %v282_v8 }
 0x344   :  { %v1624_v2 = vperm.slane %v1618_v17, 0  ;;  %v1633_v26 = vperm.slane %v1618_v17, 1  ;;  %1729 = vst [vmem:[#allocation2 + $0x1] sm:$0x7] %v1618_v17  ;;  %v1642_v29 = vperm.slane %v1618_v17, 2  ;;  %v1706_v17 = vpop.permute.xlu1 %1705 }
 0x346   :  { %v1625_v9 = vmul.f32 %v1624_v2, %v500_v62  ;;  %v1626_v16 = vmul.f32 %v1624_v2, %v502_v25  ;;  %v1627_v43 = vmul.f32 %v1624_v2, %v505_v52  ;;  %v1628_v27 = vmul.f32 %v1624_v2, %v507_v13 }
 0x347   :  { %v1634_v35 = vmul.f32 %v1633_v26, %v510_v42  ;;  %v1635_v24 = vmul.f32 %v1633_v26, %v512_v49  ;;  %v1636_v18 = vmul.f32 %v1633_v26, %v515_v36  ;;  %v1637_v61 = vmul.f32 %v1633_v26, %v517_v53  ;;  %v1701_v42 = vpop.permute.xlu0 %1700 }
 0x348   :  { %v1629_v10 = vadd.f32 %v1625_v9, %v530_v54  ;;  %v1630_v58 = vadd.f32 %v1626_v16, %v532_v38  ;;  %v1631_v4 = vadd.f32 %v1627_v43, %v535_v14  ;;  %v1632_v30 = vadd.f32 %v1628_v27, %v537_v32 }
 0x349   :  { %v1643_v37 = vmul.f32 %v1642_v29, %v520_v21  ;;  %v1644_v46 = vmul.f32 %v1642_v29, %v522_v48  ;;  %v1645_v63 = vmul.f32 %v1642_v29, %v525_v23  ;;  %v1646_v5 = vmul.f32 %v1642_v29, %v527_v6 }
 0x34a   :  { %v1638_v47 = vadd.f32 %v1634_v35, %v1629_v10  ;;  %v1639_v15 = vadd.f32 %v1635_v24, %v1630_v58  ;;  %v1640_v1 = vadd.f32 %v1636_v18, %v1631_v4  ;;  %v1641_v44 = vadd.f32 %v1637_v61, %v1632_v30 }
 0x34b   :  { %v1623_v25 = vmax.f32 %v557_v57, 0.0  ;;  %v1708_v49 = vmul.f32 %v1691_v59, %v1620_v20  ;;  %v1710_v3 = vmul.f32 %v1701_v42, %v1622_v50  ;;  %v545_v24 = vadd.f32 %v2894_v28, %v2902_v51 }
 0x34c   :  { %v1647_v39 = vadd.f32 %v1643_v37, %v1638_v47  ;;  %v1648_v0 = vadd.f32 %v1644_v46, %v1639_v15  ;;  %v1649_v55 = vadd.f32 %v1645_v63, %v1640_v1  ;;  %v1650_v62 = vadd.f32 %v1646_v5, %v1641_v44  ;;  %v1725_v1 = vpop.permute.xlu2 %1724 }
 0x34d   :  { %v1712_v23 = vadd.f32 %v1709_v60, %v1708_v49  ;;  %v1711_v6 = vmul.f32 %v1706_v17, %v1623_v25 }
 0x34e   :  { %v1655_v34 = vmin.f32 %v1647_v39, 0.0  ;;  %v1656_v52 = vmin.f32 %v1648_v0, 0.0  ;;  %v1657_v13 = vmin.f32 %v1649_v55, 0.0  ;;  %v1658_v45 = vmin.f32 %v1650_v62, 0.0 }
 0x34f   :  { %v1713_v54 = vadd.f32 %v1712_v23, %v1710_v3  ;;  %vm1651_vm1 = vcmp.gt.f32.partialorder %v1647_v39, 0.0  ;;  %vm1652_vm2 = vcmp.gt.f32.partialorder %v1648_v0, 0.0  ;;  %vm1653_vm3 = vcmp.gt.f32.partialorder %v1649_v55, 0.0 }
 0x350   :  { %v1659_v36 = vmul.f32 1.442695, %v1655_v34  ;;  %v1661_v53 = vmul.f32 1.442695, %v1656_v52  ;;  %v1663_v21 = vmul.f32 1.442695, %v1657_v13 }
 0x351   :  { %v1665_v48 = vmul.f32 1.442695, %v1658_v45  ;;  %v1714_v38 = vadd.f32 %v1713_v54, %v1711_v6  ;;  %vm1654_vm4 = vcmp.gt.f32.partialorder %v1650_v62, 0.0 }
 0x352   :  { %1885 = vpow2.f32 %v1659_v36 }
 0x353   :  { %1887 = vpow2.f32 %v1661_v53  ;;  %v1715_v59 = vrot.slane %v1714_v38, 4 }
 0x354   :  { %1889 = vpow2.f32 %v1663_v21 }
 0x355   :  { %1891 = vpow2.f32 %v1665_v48  ;;  %v1716_v7 = vadd.f32 %v1715_v59, %v1714_v38 }
 0x357   :  { %v1717_v4 = vrot.slane %v1716_v7, 2 }
 0x358   :  { %v1886_v14 = vpop.eup %1885 }
 0x359   :  { %v1888_v32 = vpop.eup %1887  ;;  %v1850_v2 = vadd.f32 -1.0, %v1886_v14  ;;  %v1718_v46 = vadd.f32 %v1717_v4, %v1716_v7 }
 0x35a   :  { %v1890_v26 = vpop.eup %1889  ;;  %v1851_v40 = vadd.f32 -1.0, %v1888_v32 }
 0x35b   :  { %v1892_v29 = vpop.eup %1891  ;;  %v1671_v9 = vsel %vm1651_vm1, %v1647_v39, %v1850_v2  ;;  %v1852_v16 = vadd.f32 -1.0, %v1890_v26  ;;  %v1719_v19 = vrot.slane %v1718_v46, 1 }
 0x35c   :  { %v1672_v43 = vsel %vm1652_vm2, %v1648_v0, %v1851_v40  ;;  %v1853_v27 = vadd.f32 -1.0, %v1892_v29  ;;  %v1675_v35 = vmul.f32 %v1671_v9, %v540_v22 }
 0x35d   :  { %v1673_v18 = vsel %vm1653_vm3, %v1649_v55, %v1852_v16  ;;  %v1676_v11 = vmul.f32 %v1672_v43, %v542_v31  ;;  %v1720_v15 = vadd.f32 %v1719_v19, %v1718_v46 }
 0x35e   :  { %v1674_v61 = vsel %vm1654_vm4, %v1650_v62, %v1853_v27  ;;  %v1677_v41 = vmul.f32 %v1673_v18, %v545_v24 }
 0x35f   :  { %v1679_v33 = vadd.f32 %v1676_v11, %v1675_v35  ;;  %v1678_v10 = vmul.f32 %v1674_v61, %v547_v12 }
 0x361   :  { %v1680_v58 = vadd.f32 %v1679_v33, %v1677_v41 }
 0x363   :  { %v1681_v30 = vadd.f32 %v1680_v58, %v1678_v10 }
 0x365   :  { %v1682_v37 = vrot.slane %v1681_v30, 4 }
 0x367   :  { %v1683_v63 = vadd.f32 %v1682_v37, %v1681_v30 }
 0x369   :  { %v1684_v5 = vrot.slane %v1683_v63, 2 }
 0x36b   :  { %v1685_v28 = vadd.f32 %v1684_v5, %v1683_v63 }
 0x36d   :  { %v1686_v51 = vrot.slane %v1685_v28, 1 }
 0x36f   :  { %v1687_v47 = vadd.f32 %v1686_v51, %v1685_v28 }
 0x371   :  { %v1721_v56 = vadd.f32 %v1720_v15, %v1687_v47 }
 0x373   :  { %v1727_v44 = vadd.f32 %v1725_v1, %v1721_v56 }
 0x375   :  { %1728 = vst [vmem:[#allocation2] sm:$0x1] %v1727_v44 }
 0x376   :  { %1740 = dma.vmem_to_hbm [thread:$0]  %s1736_s11, 64, %s1738_s14, [#allocation3]  }
 0x377   :  { %1917 = dma.done.wait [#allocation3], 64  }
 0x378   :  { %1918 = vsyncadd [#allocation3], 4294967232 }
 0x379   :  { %1745 = vsyncpa [#allocation3], 1 }

</bundles_post_ra>
